<compile_context>
chip_gen: v7x
topology: tpu7x:2x2x1
jax: 0.10.0
libtpu: 0.0.40
codegen_flags: <defaults>
</compile_context>

<pallas_src>
import jax
import jax.numpy as jnp
from jax.experimental import pallas as pl
from jax.experimental.pallas import tpu as pltpu

# ---------------- configuration (small synthetic sizes) ----------------
N = 16                 # total nodes across all graphs
E = 24                 # total edges
G = 2                  # number of graphs
GRAPH_SIZES = (6, 10)  # sum == N
NODE_FEATS = 8
EDGE_FEATS = 6
LATENT = 16            # latent_dim
OUTPUT_DIM = 0         # out_params branch disabled
MULTI_H = 4            # multi_h_emb_weight
MAX_K = 3
MAX_BLOCK = 3
EPS = 1e-5

# ---------------- packed parameter layout ----------------
# Weight pack [WP_ROWS, LATENT]; every segment starts on an 8-row (sublane) boundary.
WN_W = 0                              # [NODE_FEATS, LATENT]           rows   0:8
WE_W = 8                              # [EDGE_FEATS, LATENT]           rows   8:14
CONV_W = 16                           # MAX_K x [LATENT, LATENT]       rows  16:64
KW = CONV_W + MAX_K * LATENT          # MAX_K x [LATENT, LATENT]       rows  64:112
AW1_W = KW + MAX_K * LATENT           # [LATENT, LATENT]               rows 112:128
AW2_W = AW1_W + LATENT                # [LATENT, LATENT] (:MULTI_H)    rows 128:144
WP_ROWS = AW2_W + LATENT              # 144

# Scalar / bias / BN pack [SP_ROWS_PAD, LATENT]; one row per vector parameter.
S_WN_B, S_BN1_G, S_BN1_B = 0, 1, 2
S_WE_B, S_BNE1_G, S_BNE1_B = 3, 4, 5
S_CONV_B = 6
S_BN2_G = S_CONV_B + MAX_K            # 9
S_BN2_B = S_BN2_G + MAX_K             # 12
S_BN3_G = S_BN2_B + MAX_K             # 15
S_BN3_B = S_BN3_G + 1                 # 16
S_AW1_B, S_BN4_G, S_BN4_B = S_BN3_B + 1, S_BN3_B + 2, S_BN3_B + 3       # 17,18,19
S_AW2_B, S_BN5_G, S_BN5_B = S_BN4_B + 1, S_BN4_B + 2, S_BN4_B + 3       # 20,21,22
SP_ROWS = S_BN5_B + 1                 # 23
SP_ROWS_PAD = ((SP_ROWS + 7) // 8) * 8  # 24


def _bn(x, gamma, beta):
    """BatchNorm1d training-mode forward, single-pass (E[x], E[x^2])."""
    inv_n = 1.0 / x.shape[0]
    mean = jnp.sum(x, axis=0, keepdims=True) * inv_n
    ex2 = jnp.sum(x * x, axis=0, keepdims=True) * inv_n
    var = ex2 - mean * mean
    return (x - mean) * jax.lax.rsqrt(var + EPS) * gamma + beta


# ---------------------------- Pallas kernel ----------------------------
def dagcn_kernel(node_feat_ref, edge_feat_ref, n2n_ref, e2n_ref, subg_ref,
                 wpack_ref, spack_ref, gemb_ref):
    f32 = jnp.float32
    node_feat = node_feat_ref[...]
    edge_feat = edge_feat_ref[...]
    n2n = n2n_ref[...]
    e2n = e2n_ref[...]
    subg = subg_ref[...]
    wpack = wpack_ref[...]
    spack = spack_ref[...]

    def w(row0, nrows):                       # static weight sub-block
        return wpack[row0:row0 + nrows, :]

    def s(row, width=LATENT):                 # static bias / BN row
        return spack[row:row + 1, :width]

    # ------------------------- attention_gcn -------------------------
    x = jnp.dot(node_feat, w(WN_W, NODE_FEATS), preferred_element_type=f32) + s(S_WN_B)
    input_message = _bn(x, s(S_BN1_G), s(S_BN1_B))

    xe = jnp.dot(edge_feat, w(WE_W, EDGE_FEATS), preferred_element_type=f32) + s(S_WE_B)
    xe = _bn(xe, s(S_BNE1_G), s(S_BNE1_B))
    input_message = input_message + jnp.dot(e2n, xe, preferred_element_type=f32)

    input_potential = jnp.maximum(input_message, 0.0)

    cur = input_potential
    for block in range(MAX_BLOCK):
        block_input = cur if block == 0 else cur + input_potential
        # ---- multi_hop_embedding (concat-free: per-step k_weight partials) ----
        input_x = block_input
        h_acc = None
        for step in range(MAX_K):
            n2npool = jnp.dot(n2n, input_x, preferred_element_type=f32) + block_input
            input_x = (jnp.dot(n2npool, w(CONV_W + step * LATENT, LATENT),
                               preferred_element_type=f32) + s(S_CONV_B + step))
            input_x = _bn(input_x, s(S_BN2_G + step), s(S_BN2_B + step))
            part = jnp.dot(input_x, w(KW + step * LATENT, LATENT),
                           preferred_element_type=f32)
            h_acc = part if h_acc is None else h_acc + part
        h = _bn(h_acc, s(S_BN3_G), s(S_BN3_B))
        cur = jnp.maximum(h, 0.0)

    node_emb = cur   # OUTPUT_DIM == 0 -> no out_params projection

    # ----------------------- attention_pooling -----------------------
    a1 = jnp.tanh(jnp.dot(node_emb, w(AW1_W, LATENT), preferred_element_type=f32)
                  + s(S_AW1_B))
    a1 = _bn(a1, s(S_BN4_G), s(S_BN4_B))
    a2 = (jnp.dot(a1, w(AW2_W, LATENT), preferred_element_type=f32)[:, :MULTI_H]
          + s(S_AW2_B, MULTI_H))
    a2 = _bn(a2, s(S_BN5_G, MULTI_H), s(S_BN5_B, MULTI_H))       # [N, MULTI_H]
    alpha = jax.nn.softmax(a2, axis=-1)
    # TODO(synk): F.dropout on alpha (training-mode randomness) omitted; identity here.

    # Fused pooling: one lane-dense [N, MULTI_H*LATENT] weighted matrix,
    # one matmul with subg, one 64-lane store.
    weighted = jnp.concatenate(
        [node_emb * alpha[:, hh:hh + 1] for hh in range(MULTI_H)], axis=1)
    gemb_ref[...] = jnp.maximum(
        jnp.dot(subg, weighted, preferred_element_type=f32), 0.0)


# ------------------------------ wrapper ------------------------------
def _pack_params(p):
    def padc(a):  # pad last dim (MULTI_H) up to LATENT
        return jnp.pad(a, ((0, 0), (0, LATENT - a.shape[1])))

    wpack = jnp.zeros((WP_ROWS, LATENT), jnp.float32)
    for row0, a in (
        (WN_W, p["wn_w"]),
        (WE_W, p["we_w"]),
        (CONV_W, p["conv_w"].reshape(MAX_K * LATENT, LATENT)),
        (KW, p["kw"]),
        (AW1_W, p["aw1_w"]),
        (AW2_W, padc(p["aw2_w"])),
    ):
        wpack = wpack.at[row0:row0 + a.shape[0], :].set(a)

    spack = jnp.zeros((SP_ROWS_PAD, LATENT), jnp.float32)
    for row0, a in (
        (S_WN_B, p["wn_b"]), (S_BN1_G, p["bn1_g"]), (S_BN1_B, p["bn1_b"]),
        (S_WE_B, p["we_b"]), (S_BNE1_G, p["bne1_g"]), (S_BNE1_B, p["bne1_b"]),
        (S_CONV_B, p["conv_b"].reshape(MAX_K, LATENT)),
        (S_BN2_G, p["bn2_g"].reshape(MAX_K, LATENT)),
        (S_BN2_B, p["bn2_b"].reshape(MAX_K, LATENT)),
        (S_BN3_G, p["bn3_g"]), (S_BN3_B, p["bn3_b"]),
        (S_AW1_B, p["aw1_b"]), (S_BN4_G, p["bn4_g"]), (S_BN4_B, p["bn4_b"]),
        (S_AW2_B, padc(p["aw2_b"])), (S_BN5_G, padc(p["bn5_g"])),
        (S_BN5_B, padc(p["bn5_b"])),
    ):
        spack = spack.at[row0:row0 + a.shape[0], :].set(a)
    return wpack, spack


@jax.jit
def dagcn_forward(node_feat, edge_feat, n2n, e2n, subg, params):
    wpack, spack = _pack_params(params)
    vmem = pl.BlockSpec(memory_space=pltpu.MemorySpace.VMEM)
    gemb = pl.pallas_call(
        dagcn_kernel,
        out_shape=jax.ShapeDtypeStruct((G, MULTI_H * LATENT), jnp.float32),
        in_specs=[vmem] * 7,
        out_specs=vmem,
    )(node_feat, edge_feat, n2n, e2n, subg, wpack, spack)

    # L1 regularization over >1-dim parameters: parameter-only, computed outside
    # the kernel (per perf review) but inside the same jit.
    reg = sum(jnp.sum(jnp.abs(params[k]))
              for k in ("wn_w", "we_w", "conv_w", "kw", "aw1_w", "aw2_w"))
    return gemb, reg / float(G)


# ----------------------- pure-JAX reference -----------------------
def _bn_ref(x, gamma, beta):
    mean = jnp.mean(x, axis=0, keepdims=True)
    var = jnp.mean((x - mean) ** 2, axis=0, keepdims=True)
    return (x - mean) * jax.lax.rsqrt(var + EPS) * gamma + beta


def reference_forward(node_feat, edge_feat, n2n, e2n, subg, p):
    x = node_feat @ p["wn_w"] + p["wn_b"]
    input_message = _bn_ref(x, p["bn1_g"], p["bn1_b"])
    xe = _bn_ref(edge_feat @ p["we_w"] + p["we_b"], p["bne1_g"], p["bne1_b"])
    input_message = input_message + e2n @ xe
    input_potential = jnp.maximum(input_message, 0.0)

    cur = input_potential
    for block in range(MAX_BLOCK):
        block_input = cur if block == 0 else cur + input_potential
        input_x = block_input
        cols = []
        for step in range(MAX_K):
            n2npool = n2n @ input_x + block_input
            input_x = _bn_ref(n2npool @ p["conv_w"][step] + p["conv_b"][step],
                              p["bn2_g"][step], p["bn2_b"][step])
            cols.append(input_x)
        result = jnp.concatenate(cols, axis=1)
        cur = jnp.maximum(_bn_ref(result @ p["kw"], p["bn3_g"], p["bn3_b"]), 0.0)

    node_emb = cur
    a1 = _bn_ref(jnp.tanh(node_emb @ p["aw1_w"] + p["aw1_b"]), p["bn4_g"], p["bn4_b"])
    a2 = _bn_ref(a1 @ p["aw2_w"] + p["aw2_b"], p["bn5_g"], p["bn5_b"])
    alpha = jax.nn.softmax(a2, axis=-1)
    gemb = jnp.einsum("gn,nh,nd->ghd", subg, alpha, node_emb)
    gemb = jnp.maximum(gemb.reshape(G, MULTI_H * LATENT), 0.0)

    reg = sum(jnp.sum(jnp.abs(p[k])) for k in
              ("wn_w", "we_w", "conv_w", "kw", "aw1_w", "aw2_w"))
    return gemb, reg / float(G)


# --------------------------- parameters ---------------------------
def make_params(key):
    ks = jax.random.split(key, 12)

    def w(k, shape, scale=0.1):
        return (scale * jax.random.normal(k, shape)).astype(jnp.float32)

    ones = lambda s: jnp.ones(s, jnp.float32)
    zeros = lambda s: jnp.zeros(s, jnp.float32)
    return dict(
        wn_w=w(ks[0], (NODE_FEATS, LATENT)), wn_b=w(ks[1], (1, LATENT)),
        bn1_g=ones((1, LATENT)), bn1_b=zeros((1, LATENT)),
        we_w=w(ks[2], (EDGE_FEATS, LATENT)), we_b=w(ks[3], (1, LATENT)),
        bne1_g=ones((1, LATENT)), bne1_b=zeros((1, LATENT)),
        conv_w=w(ks[4], (MAX_K, LATENT, LATENT)), conv_b=w(ks[5], (MAX_K, 1, LATENT)),
        bn2_g=ones((MAX_K, 1, LATENT)), bn2_b=zeros((MAX_K, 1, LATENT)),
        kw=w(ks[6], (MAX_K * LATENT, LATENT)),
        bn3_g=ones((1, LATENT)), bn3_b=zeros((1, LATENT)),
        aw1_w=w(ks[7], (LATENT, LATENT)), aw1_b=w(ks[8], (1, LATENT)),
        bn4_g=ones((1, LATENT)), bn4_b=zeros((1, LATENT)),
        aw2_w=w(ks[9], (LATENT, MULTI_H)), aw2_b=w(ks[10], (1, MULTI_H)),
        bn5_g=ones((1, MULTI_H)), bn5_b=zeros((1, MULTI_H)),
    )


if __name__ == "__main__":
    key = jax.random.PRNGKey(0)
    k1, k2, k3, k4, kp = jax.random.split(key, 5)

    node_feat = jax.random.normal(k1, (N, NODE_FEATS), jnp.float32)
    edge_feat = jax.random.normal(k2, (E, EDGE_FEATS), jnp.float32)

    # graph membership indicator [G, N]
    rows = []
    off = 0
    for gs in GRAPH_SIZES:
        r = jnp.zeros((N,), jnp.float32).at[off:off + gs].set(1.0)
        rows.append(r)
        off += gs
    subg = jnp.stack(rows, axis=0)

    block_mask = subg.T @ subg                              # block-diagonal mask
    n2n = ((jax.random.uniform(k3, (N, N)) < 0.4).astype(jnp.float32)
           * block_mask * (1.0 - jnp.eye(N, dtype=jnp.float32)))
    e2n = (jax.random.uniform(k4, (N, E)) < 0.15).astype(jnp.float32)

    params = make_params(kp)

    gemb, reg = dagcn_forward(node_feat, edge_feat, n2n, e2n, subg, params)
    jax.block_until_ready((gemb, reg))

    gemb_ref, reg_ref = reference_forward(node_feat, edge_feat, n2n, e2n, subg, params)
    assert gemb.shape == (G, MULTI_H * LATENT)
    assert jnp.allclose(gemb, gemb_ref, rtol=1e-4, atol=1e-4), "graph emb mismatch"
    assert jnp.allclose(reg, reg_ref, rtol=1e-5, atol=1e-5), "reg term mismatch"

    print("KERNEL_OK")
</pallas_src>

<mosaic_0001>
module attributes {stable_mosaic.version = 11 : i64} {
  func.func @dagcn_kernel(%arg0: memref<16x8xf32, #tpu.memory_space<vmem>>, %arg1: memref<24x6xf32, #tpu.memory_space<vmem>>, %arg2: memref<16x16xf32, #tpu.memory_space<vmem>>, %arg3: memref<16x24xf32, #tpu.memory_space<vmem>>, %arg4: memref<2x16xf32, #tpu.memory_space<vmem>>, %arg5: memref<144x16xf32, #tpu.memory_space<vmem>>, %arg6: memref<24x16xf32, #tpu.memory_space<vmem>>, %arg7: memref<2x64xf32, #tpu.memory_space<vmem>>) attributes {dimension_semantics = [], scalar_prefetch = 0 : i64, scratch_operands = 0 : i64, tpu.core_type = #tpu.core_type<tc>} {
    %c0 = arith.constant 0 : index
    %c0_0 = arith.constant 0 : index
    %0 = vector.load %arg0[%c0, %c0_0] : memref<16x8xf32, #tpu.memory_space<vmem>>, vector<16x8xf32>
    %c0_1 = arith.constant 0 : index
    %c0_2 = arith.constant 0 : index
    %1 = vector.load %arg1[%c0_1, %c0_2] : memref<24x6xf32, #tpu.memory_space<vmem>>, vector<24x6xf32>
    %c0_3 = arith.constant 0 : index
    %c0_4 = arith.constant 0 : index
    %2 = vector.load %arg2[%c0_3, %c0_4] : memref<16x16xf32, #tpu.memory_space<vmem>>, vector<16x16xf32>
    %c0_5 = arith.constant 0 : index
    %c0_6 = arith.constant 0 : index
    %3 = vector.load %arg3[%c0_5, %c0_6] : memref<16x24xf32, #tpu.memory_space<vmem>>, vector<16x24xf32>
    %c0_7 = arith.constant 0 : index
    %c0_8 = arith.constant 0 : index
    %4 = vector.load %arg4[%c0_7, %c0_8] : memref<2x16xf32, #tpu.memory_space<vmem>>, vector<2x16xf32>
    %c0_9 = arith.constant 0 : index
    %c0_10 = arith.constant 0 : index
    %5 = vector.load %arg5[%c0_9, %c0_10] : memref<144x16xf32, #tpu.memory_space<vmem>>, vector<144x16xf32>
    %c0_11 = arith.constant 0 : index
    %c0_12 = arith.constant 0 : index
    %6 = vector.load %arg6[%c0_11, %c0_12] : memref<24x16xf32, #tpu.memory_space<vmem>>, vector<24x16xf32>
    %7 = vector.extract_strided_slice %5 {offsets = [0, 0], sizes = [8, 16], strides = [1, 1]} : vector<144x16xf32> to vector<8x16xf32>
    %cst = arith.constant dense<0.000000e+00> : vector<16x16xf32>
    %8 = tpu.matmul %0, %7, %cst {dimension_numbers = #tpu.dot_dimension_numbers<[1], [0], [0], [1], [0, 0, 1, 1], [], []>} : vector<16x8xf32>, vector<8x16xf32>, vector<16x16xf32> -> vector<16x16xf32>
    %9 = vector.extract_strided_slice %6 {offsets = [0, 0], sizes = [1, 16], strides = [1, 1]} : vector<24x16xf32> to vector<1x16xf32>
    %10 = vector.broadcast %9 : vector<1x16xf32> to vector<16x16xf32>
    %11 = arith.addf %8, %10 : vector<16x16xf32>
    %12 = vector.extract_strided_slice %6 {offsets = [1, 0], sizes = [1, 16], strides = [1, 1]} : vector<24x16xf32> to vector<1x16xf32>
    %13 = vector.extract_strided_slice %6 {offsets = [2, 0], sizes = [1, 16], strides = [1, 1]} : vector<24x16xf32> to vector<1x16xf32>
    %cst_13 = arith.constant dense<0.000000e+00> : vector<16xf32>
    %14 = vector.multi_reduction <add>, %11, %cst_13 [0] : vector<16x16xf32> to vector<16xf32>
    %15 = vector.shape_cast %14 : vector<16xf32> to vector<1x16xf32>
    %cst_14 = arith.constant 6.250000e-02 : f32
    %16 = vector.broadcast %cst_14 : f32 to vector<1x16xf32>
    %17 = arith.mulf %15, %16 : vector<1x16xf32>
    %18 = arith.mulf %11, %11 : vector<16x16xf32>
    %cst_15 = arith.constant dense<0.000000e+00> : vector<16xf32>
    %19 = vector.multi_reduction <add>, %18, %cst_15 [0] : vector<16x16xf32> to vector<16xf32>
    %20 = vector.shape_cast %19 : vector<16xf32> to vector<1x16xf32>
    %cst_16 = arith.constant 6.250000e-02 : f32
    %21 = vector.broadcast %cst_16 : f32 to vector<1x16xf32>
    %22 = arith.mulf %20, %21 : vector<1x16xf32>
    %23 = arith.mulf %17, %17 : vector<1x16xf32>
    %24 = arith.subf %22, %23 : vector<1x16xf32>
    %25 = vector.broadcast %17 : vector<1x16xf32> to vector<16x16xf32>
    %26 = arith.subf %11, %25 : vector<16x16xf32>
    %cst_17 = arith.constant 9.99999974E-6 : f32
    %27 = vector.broadcast %cst_17 : f32 to vector<1x16xf32>
    %28 = arith.addf %24, %27 : vector<1x16xf32>
    %29 = math.rsqrt %28 : vector<1x16xf32>
    %30 = vector.broadcast %29 : vector<1x16xf32> to vector<16x16xf32>
    %31 = arith.mulf %26, %30 : vector<16x16xf32>
    %32 = vector.broadcast %12 : vector<1x16xf32> to vector<16x16xf32>
    %33 = arith.mulf %31, %32 : vector<16x16xf32>
    %34 = vector.broadcast %13 : vector<1x16xf32> to vector<16x16xf32>
    %35 = arith.addf %33, %34 : vector<16x16xf32>
    %36 = vector.extract_strided_slice %5 {offsets = [8, 0], sizes = [6, 16], strides = [1, 1]} : vector<144x16xf32> to vector<6x16xf32>
    %cst_18 = arith.constant dense<0.000000e+00> : vector<24x16xf32>
    %37 = tpu.matmul %1, %36, %cst_18 {dimension_numbers = #tpu.dot_dimension_numbers<[1], [0], [0], [1], [0, 0, 1, 1], [], []>} : vector<24x6xf32>, vector<6x16xf32>, vector<24x16xf32> -> vector<24x16xf32>
    %38 = vector.extract_strided_slice %6 {offsets = [3, 0], sizes = [1, 16], strides = [1, 1]} : vector<24x16xf32> to vector<1x16xf32>
    %39 = vector.broadcast %38 : vector<1x16xf32> to vector<24x16xf32>
    %40 = arith.addf %37, %39 : vector<24x16xf32>
    %41 = vector.extract_strided_slice %6 {offsets = [4, 0], sizes = [1, 16], strides = [1, 1]} : vector<24x16xf32> to vector<1x16xf32>
    %42 = vector.extract_strided_slice %6 {offsets = [5, 0], sizes = [1, 16], strides = [1, 1]} : vector<24x16xf32> to vector<1x16xf32>
    %cst_19 = arith.constant dense<0.000000e+00> : vector<16xf32>
    %43 = vector.multi_reduction <add>, %40, %cst_19 [0] : vector<24x16xf32> to vector<16xf32>
    %44 = vector.shape_cast %43 : vector<16xf32> to vector<1x16xf32>
    %cst_20 = arith.constant 0.0416666679 : f32
    %45 = vector.broadcast %cst_20 : f32 to vector<1x16xf32>
    %46 = arith.mulf %44, %45 : vector<1x16xf32>
    %47 = arith.mulf %40, %40 : vector<24x16xf32>
    %cst_21 = arith.constant dense<0.000000e+00> : vector<16xf32>
    %48 = vector.multi_reduction <add>, %47, %cst_21 [0] : vector<24x16xf32> to vector<16xf32>
    %49 = vector.shape_cast %48 : vector<16xf32> to vector<1x16xf32>
    %cst_22 = arith.constant 0.0416666679 : f32
    %50 = vector.broadcast %cst_22 : f32 to vector<1x16xf32>
    %51 = arith.mulf %49, %50 : vector<1x16xf32>
    %52 = arith.mulf %46, %46 : vector<1x16xf32>
    %53 = arith.subf %51, %52 : vector<1x16xf32>
    %54 = vector.broadcast %46 : vector<1x16xf32> to vector<24x16xf32>
    %55 = arith.subf %40, %54 : vector<24x16xf32>
    %cst_23 = arith.constant 9.99999974E-6 : f32
    %56 = vector.broadcast %cst_23 : f32 to vector<1x16xf32>
    %57 = arith.addf %53, %56 : vector<1x16xf32>
    %58 = math.rsqrt %57 : vector<1x16xf32>
    %59 = vector.broadcast %58 : vector<1x16xf32> to vector<24x16xf32>
    %60 = arith.mulf %55, %59 : vector<24x16xf32>
    %61 = vector.broadcast %41 : vector<1x16xf32> to vector<24x16xf32>
    %62 = arith.mulf %60, %61 : vector<24x16xf32>
    %63 = vector.broadcast %42 : vector<1x16xf32> to vector<24x16xf32>
    %64 = arith.addf %62, %63 : vector<24x16xf32>
    %cst_24 = arith.constant dense<0.000000e+00> : vector<16x16xf32>
    %65 = tpu.matmul %3, %64, %cst_24 {dimension_numbers = #tpu.dot_dimension_numbers<[1], [0], [0], [1], [0, 0, 1, 1], [], []>} : vector<16x24xf32>, vector<24x16xf32>, vector<16x16xf32> -> vector<16x16xf32>
    %66 = arith.addf %35, %65 : vector<16x16xf32>
    %cst_25 = arith.constant 0.000000e+00 : f32
    %67 = vector.broadcast %cst_25 : f32 to vector<16x16xf32>
    %68 = arith.maximumf %66, %67 : vector<16x16xf32>
    %cst_26 = arith.constant dense<0.000000e+00> : vector<16x16xf32>
    %69 = tpu.matmul %2, %68, %cst_26 {dimension_numbers = #tpu.dot_dimension_numbers<[1], [0], [0], [1], [0, 0, 1, 1], [], []>} : vector<16x16xf32>, vector<16x16xf32>, vector<16x16xf32> -> vector<16x16xf32>
    %70 = arith.addf %69, %68 : vector<16x16xf32>
    %71 = vector.extract_strided_slice %5 {offsets = [16, 0], sizes = [16, 16], strides = [1, 1]} : vector<144x16xf32> to vector<16x16xf32>
    %cst_27 = arith.constant dense<0.000000e+00> : vector<16x16xf32>
    %72 = tpu.matmul %70, %71, %cst_27 {dimension_numbers = #tpu.dot_dimension_numbers<[1], [0], [0], [1], [0, 0, 1, 1], [], []>} : vector<16x16xf32>, vector<16x16xf32>, vector<16x16xf32> -> vector<16x16xf32>
    %73 = vector.extract_strided_slice %6 {offsets = [6, 0], sizes = [1, 16], strides = [1, 1]} : vector<24x16xf32> to vector<1x16xf32>
    %74 = vector.broadcast %73 : vector<1x16xf32> to vector<16x16xf32>
    %75 = arith.addf %72, %74 : vector<16x16xf32>
    %76 = vector.extract_strided_slice %6 {offsets = [9, 0], sizes = [1, 16], strides = [1, 1]} : vector<24x16xf32> to vector<1x16xf32>
    %77 = vector.extract_strided_slice %6 {offsets = [12, 0], sizes = [1, 16], strides = [1, 1]} : vector<24x16xf32> to vector<1x16xf32>
    %cst_28 = arith.constant dense<0.000000e+00> : vector<16xf32>
    %78 = vector.multi_reduction <add>, %75, %cst_28 [0] : vector<16x16xf32> to vector<16xf32>
    %79 = vector.shape_cast %78 : vector<16xf32> to vector<1x16xf32>
    %cst_29 = arith.constant 6.250000e-02 : f32
    %80 = vector.broadcast %cst_29 : f32 to vector<1x16xf32>
    %81 = arith.mulf %79, %80 : vector<1x16xf32>
    %82 = arith.mulf %75, %75 : vector<16x16xf32>
    %cst_30 = arith.constant dense<0.000000e+00> : vector<16xf32>
    %83 = vector.multi_reduction <add>, %82, %cst_30 [0] : vector<16x16xf32> to vector<16xf32>
    %84 = vector.shape_cast %83 : vector<16xf32> to vector<1x16xf32>
    %cst_31 = arith.constant 6.250000e-02 : f32
    %85 = vector.broadcast %cst_31 : f32 to vector<1x16xf32>
    %86 = arith.mulf %84, %85 : vector<1x16xf32>
    %87 = arith.mulf %81, %81 : vector<1x16xf32>
    %88 = arith.subf %86, %87 : vector<1x16xf32>
    %89 = vector.broadcast %81 : vector<1x16xf32> to vector<16x16xf32>
    %90 = arith.subf %75, %89 : vector<16x16xf32>
    %cst_32 = arith.constant 9.99999974E-6 : f32
    %91 = vector.broadcast %cst_32 : f32 to vector<1x16xf32>
    %92 = arith.addf %88, %91 : vector<1x16xf32>
    %93 = math.rsqrt %92 : vector<1x16xf32>
    %94 = vector.broadcast %93 : vector<1x16xf32> to vector<16x16xf32>
    %95 = arith.mulf %90, %94 : vector<16x16xf32>
    %96 = vector.broadcast %76 : vector<1x16xf32> to vector<16x16xf32>
    %97 = arith.mulf %95, %96 : vector<16x16xf32>
    %98 = vector.broadcast %77 : vector<1x16xf32> to vector<16x16xf32>
    %99 = arith.addf %97, %98 : vector<16x16xf32>
    %100 = vector.extract_strided_slice %5 {offsets = [64, 0], sizes = [16, 16], strides = [1, 1]} : vector<144x16xf32> to vector<16x16xf32>
    %cst_33 = arith.constant dense<0.000000e+00> : vector<16x16xf32>
    %101 = tpu.matmul %99, %100, %cst_33 {dimension_numbers = #tpu.dot_dimension_numbers<[1], [0], [0], [1], [0, 0, 1, 1], [], []>} : vector<16x16xf32>, vector<16x16xf32>, vector<16x16xf32> -> vector<16x16xf32>
    %cst_34 = arith.constant dense<0.000000e+00> : vector<16x16xf32>
    %102 = tpu.matmul %2, %99, %cst_34 {dimension_numbers = #tpu.dot_dimension_numbers<[1], [0], [0], [1], [0, 0, 1, 1], [], []>} : vector<16x16xf32>, vector<16x16xf32>, vector<16x16xf32> -> vector<16x16xf32>
    %103 = arith.addf %102, %68 : vector<16x16xf32>
    %104 = vector.extract_strided_slice %5 {offsets = [32, 0], sizes = [16, 16], strides = [1, 1]} : vector<144x16xf32> to vector<16x16xf32>
    %cst_35 = arith.constant dense<0.000000e+00> : vector<16x16xf32>
    %105 = tpu.matmul %103, %104, %cst_35 {dimension_numbers = #tpu.dot_dimension_numbers<[1], [0], [0], [1], [0, 0, 1, 1], [], []>} : vector<16x16xf32>, vector<16x16xf32>, vector<16x16xf32> -> vector<16x16xf32>
    %106 = vector.extract_strided_slice %6 {offsets = [7, 0], sizes = [1, 16], strides = [1, 1]} : vector<24x16xf32> to vector<1x16xf32>
    %107 = vector.broadcast %106 : vector<1x16xf32> to vector<16x16xf32>
    %108 = arith.addf %105, %107 : vector<16x16xf32>
    %109 = vector.extract_strided_slice %6 {offsets = [10, 0], sizes = [1, 16], strides = [1, 1]} : vector<24x16xf32> to vector<1x16xf32>
    %110 = vector.extract_strided_slice %6 {offsets = [13, 0], sizes = [1, 16], strides = [1, 1]} : vector<24x16xf32> to vector<1x16xf32>
    %cst_36 = arith.constant dense<0.000000e+00> : vector<16xf32>
    %111 = vector.multi_reduction <add>, %108, %cst_36 [0] : vector<16x16xf32> to vector<16xf32>
    %112 = vector.shape_cast %111 : vector<16xf32> to vector<1x16xf32>
    %cst_37 = arith.constant 6.250000e-02 : f32
    %113 = vector.broadcast %cst_37 : f32 to vector<1x16xf32>
    %114 = arith.mulf %112, %113 : vector<1x16xf32>
    %115 = arith.mulf %108, %108 : vector<16x16xf32>
    %cst_38 = arith.constant dense<0.000000e+00> : vector<16xf32>
    %116 = vector.multi_reduction <add>, %115, %cst_38 [0] : vector<16x16xf32> to vector<16xf32>
    %117 = vector.shape_cast %116 : vector<16xf32> to vector<1x16xf32>
    %cst_39 = arith.constant 6.250000e-02 : f32
    %118 = vector.broadcast %cst_39 : f32 to vector<1x16xf32>
    %119 = arith.mulf %117, %118 : vector<1x16xf32>
    %120 = arith.mulf %114, %114 : vector<1x16xf32>
    %121 = arith.subf %119, %120 : vector<1x16xf32>
    %122 = vector.broadcast %114 : vector<1x16xf32> to vector<16x16xf32>
    %123 = arith.subf %108, %122 : vector<16x16xf32>
    %cst_40 = arith.constant 9.99999974E-6 : f32
    %124 = vector.broadcast %cst_40 : f32 to vector<1x16xf32>
    %125 = arith.addf %121, %124 : vector<1x16xf32>
    %126 = math.rsqrt %125 : vector<1x16xf32>
    %127 = vector.broadcast %126 : vector<1x16xf32> to vector<16x16xf32>
    %128 = arith.mulf %123, %127 : vector<16x16xf32>
    %129 = vector.broadcast %109 : vector<1x16xf32> to vector<16x16xf32>
    %130 = arith.mulf %128, %129 : vector<16x16xf32>
    %131 = vector.broadcast %110 : vector<1x16xf32> to vector<16x16xf32>
    %132 = arith.addf %130, %131 : vector<16x16xf32>
    %133 = vector.extract_strided_slice %5 {offsets = [80, 0], sizes = [16, 16], strides = [1, 1]} : vector<144x16xf32> to vector<16x16xf32>
    %cst_41 = arith.constant dense<0.000000e+00> : vector<16x16xf32>
    %134 = tpu.matmul %132, %133, %cst_41 {dimension_numbers = #tpu.dot_dimension_numbers<[1], [0], [0], [1], [0, 0, 1, 1], [], []>} : vector<16x16xf32>, vector<16x16xf32>, vector<16x16xf32> -> vector<16x16xf32>
    %135 = arith.addf %101, %134 : vector<16x16xf32>
    %cst_42 = arith.constant dense<0.000000e+00> : vector<16x16xf32>
    %136 = tpu.matmul %2, %132, %cst_42 {dimension_numbers = #tpu.dot_dimension_numbers<[1], [0], [0], [1], [0, 0, 1, 1], [], []>} : vector<16x16xf32>, vector<16x16xf32>, vector<16x16xf32> -> vector<16x16xf32>
    %137 = arith.addf %136, %68 : vector<16x16xf32>
    %138 = vector.extract_strided_slice %5 {offsets = [48, 0], sizes = [16, 16], strides = [1, 1]} : vector<144x16xf32> to vector<16x16xf32>
    %cst_43 = arith.constant dense<0.000000e+00> : vector<16x16xf32>
    %139 = tpu.matmul %137, %138, %cst_43 {dimension_numbers = #tpu.dot_dimension_numbers<[1], [0], [0], [1], [0, 0, 1, 1], [], []>} : vector<16x16xf32>, vector<16x16xf32>, vector<16x16xf32> -> vector<16x16xf32>
    %140 = vector.extract_strided_slice %6 {offsets = [8, 0], sizes = [1, 16], strides = [1, 1]} : vector<24x16xf32> to vector<1x16xf32>
    %141 = vector.broadcast %140 : vector<1x16xf32> to vector<16x16xf32>
    %142 = arith.addf %139, %141 : vector<16x16xf32>
    %143 = vector.extract_strided_slice %6 {offsets = [11, 0], sizes = [1, 16], strides = [1, 1]} : vector<24x16xf32> to vector<1x16xf32>
    %144 = vector.extract_strided_slice %6 {offsets = [14, 0], sizes = [1, 16], strides = [1, 1]} : vector<24x16xf32> to vector<1x16xf32>
    %cst_44 = arith.constant dense<0.000000e+00> : vector<16xf32>
    %145 = vector.multi_reduction <add>, %142, %cst_44 [0] : vector<16x16xf32> to vector<16xf32>
    %146 = vector.shape_cast %145 : vector<16xf32> to vector<1x16xf32>
    %cst_45 = arith.constant 6.250000e-02 : f32
    %147 = vector.broadcast %cst_45 : f32 to vector<1x16xf32>
    %148 = arith.mulf %146, %147 : vector<1x16xf32>
    %149 = arith.mulf %142, %142 : vector<16x16xf32>
    %cst_46 = arith.constant dense<0.000000e+00> : vector<16xf32>
    %150 = vector.multi_reduction <add>, %149, %cst_46 [0] : vector<16x16xf32> to vector<16xf32>
    %151 = vector.shape_cast %150 : vector<16xf32> to vector<1x16xf32>
    %cst_47 = arith.constant 6.250000e-02 : f32
    %152 = vector.broadcast %cst_47 : f32 to vector<1x16xf32>
    %153 = arith.mulf %151, %152 : vector<1x16xf32>
    %154 = arith.mulf %148, %148 : vector<1x16xf32>
    %155 = arith.subf %153, %154 : vector<1x16xf32>
    %156 = vector.broadcast %148 : vector<1x16xf32> to vector<16x16xf32>
    %157 = arith.subf %142, %156 : vector<16x16xf32>
    %cst_48 = arith.constant 9.99999974E-6 : f32
    %158 = vector.broadcast %cst_48 : f32 to vector<1x16xf32>
    %159 = arith.addf %155, %158 : vector<1x16xf32>
    %160 = math.rsqrt %159 : vector<1x16xf32>
    %161 = vector.broadcast %160 : vector<1x16xf32> to vector<16x16xf32>
    %162 = arith.mulf %157, %161 : vector<16x16xf32>
    %163 = vector.broadcast %143 : vector<1x16xf32> to vector<16x16xf32>
    %164 = arith.mulf %162, %163 : vector<16x16xf32>
    %165 = vector.broadcast %144 : vector<1x16xf32> to vector<16x16xf32>
    %166 = arith.addf %164, %165 : vector<16x16xf32>
    %167 = vector.extract_strided_slice %5 {offsets = [96, 0], sizes = [16, 16], strides = [1, 1]} : vector<144x16xf32> to vector<16x16xf32>
    %cst_49 = arith.constant dense<0.000000e+00> : vector<16x16xf32>
    %168 = tpu.matmul %166, %167, %cst_49 {dimension_numbers = #tpu.dot_dimension_numbers<[1], [0], [0], [1], [0, 0, 1, 1], [], []>} : vector<16x16xf32>, vector<16x16xf32>, vector<16x16xf32> -> vector<16x16xf32>
    %169 = arith.addf %135, %168 : vector<16x16xf32>
    %170 = vector.extract_strided_slice %6 {offsets = [15, 0], sizes = [1, 16], strides = [1, 1]} : vector<24x16xf32> to vector<1x16xf32>
    %171 = vector.extract_strided_slice %6 {offsets = [16, 0], sizes = [1, 16], strides = [1, 1]} : vector<24x16xf32> to vector<1x16xf32>
    %cst_50 = arith.constant dense<0.000000e+00> : vector<16xf32>
    %172 = vector.multi_reduction <add>, %169, %cst_50 [0] : vector<16x16xf32> to vector<16xf32>
    %173 = vector.shape_cast %172 : vector<16xf32> to vector<1x16xf32>
    %cst_51 = arith.constant 6.250000e-02 : f32
    %174 = vector.broadcast %cst_51 : f32 to vector<1x16xf32>
    %175 = arith.mulf %173, %174 : vector<1x16xf32>
    %176 = arith.mulf %169, %169 : vector<16x16xf32>
    %cst_52 = arith.constant dense<0.000000e+00> : vector<16xf32>
    %177 = vector.multi_reduction <add>, %176, %cst_52 [0] : vector<16x16xf32> to vector<16xf32>
    %178 = vector.shape_cast %177 : vector<16xf32> to vector<1x16xf32>
    %cst_53 = arith.constant 6.250000e-02 : f32
    %179 = vector.broadcast %cst_53 : f32 to vector<1x16xf32>
    %180 = arith.mulf %178, %179 : vector<1x16xf32>
    %181 = arith.mulf %175, %175 : vector<1x16xf32>
    %182 = arith.subf %180, %181 : vector<1x16xf32>
    %183 = vector.broadcast %175 : vector<1x16xf32> to vector<16x16xf32>
    %184 = arith.subf %169, %183 : vector<16x16xf32>
    %cst_54 = arith.constant 9.99999974E-6 : f32
    %185 = vector.broadcast %cst_54 : f32 to vector<1x16xf32>
    %186 = arith.addf %182, %185 : vector<1x16xf32>
    %187 = math.rsqrt %186 : vector<1x16xf32>
    %188 = vector.broadcast %187 : vector<1x16xf32> to vector<16x16xf32>
    %189 = arith.mulf %184, %188 : vector<16x16xf32>
    %190 = vector.broadcast %170 : vector<1x16xf32> to vector<16x16xf32>
    %191 = arith.mulf %189, %190 : vector<16x16xf32>
    %192 = vector.broadcast %171 : vector<1x16xf32> to vector<16x16xf32>
    %193 = arith.addf %191, %192 : vector<16x16xf32>
    %cst_55 = arith.constant 0.000000e+00 : f32
    %194 = vector.broadcast %cst_55 : f32 to vector<16x16xf32>
    %195 = arith.maximumf %193, %194 : vector<16x16xf32>
    %196 = arith.addf %195, %68 : vector<16x16xf32>
    %cst_56 = arith.constant dense<0.000000e+00> : vector<16x16xf32>
    %197 = tpu.matmul %2, %196, %cst_56 {dimension_numbers = #tpu.dot_dimension_numbers<[1], [0], [0], [1], [0, 0, 1, 1], [], []>} : vector<16x16xf32>, vector<16x16xf32>, vector<16x16xf32> -> vector<16x16xf32>
    %198 = arith.addf %197, %196 : vector<16x16xf32>
    %199 = vector.extract_strided_slice %5 {offsets = [16, 0], sizes = [16, 16], strides = [1, 1]} : vector<144x16xf32> to vector<16x16xf32>
    %cst_57 = arith.constant dense<0.000000e+00> : vector<16x16xf32>
    %200 = tpu.matmul %198, %199, %cst_57 {dimension_numbers = #tpu.dot_dimension_numbers<[1], [0], [0], [1], [0, 0, 1, 1], [], []>} : vector<16x16xf32>, vector<16x16xf32>, vector<16x16xf32> -> vector<16x16xf32>
    %201 = vector.extract_strided_slice %6 {offsets = [6, 0], sizes = [1, 16], strides = [1, 1]} : vector<24x16xf32> to vector<1x16xf32>
    %202 = vector.broadcast %201 : vector<1x16xf32> to vector<16x16xf32>
    %203 = arith.addf %200, %202 : vector<16x16xf32>
    %204 = vector.extract_strided_slice %6 {offsets = [9, 0], sizes = [1, 16], strides = [1, 1]} : vector<24x16xf32> to vector<1x16xf32>
    %205 = vector.extract_strided_slice %6 {offsets = [12, 0], sizes = [1, 16], strides = [1, 1]} : vector<24x16xf32> to vector<1x16xf32>
    %cst_58 = arith.constant dense<0.000000e+00> : vector<16xf32>
    %206 = vector.multi_reduction <add>, %203, %cst_58 [0] : vector<16x16xf32> to vector<16xf32>
    %207 = vector.shape_cast %206 : vector<16xf32> to vector<1x16xf32>
    %cst_59 = arith.constant 6.250000e-02 : f32
    %208 = vector.broadcast %cst_59 : f32 to vector<1x16xf32>
    %209 = arith.mulf %207, %208 : vector<1x16xf32>
    %210 = arith.mulf %203, %203 : vector<16x16xf32>
    %cst_60 = arith.constant dense<0.000000e+00> : vector<16xf32>
    %211 = vector.multi_reduction <add>, %210, %cst_60 [0] : vector<16x16xf32> to vector<16xf32>
    %212 = vector.shape_cast %211 : vector<16xf32> to vector<1x16xf32>
    %cst_61 = arith.constant 6.250000e-02 : f32
    %213 = vector.broadcast %cst_61 : f32 to vector<1x16xf32>
    %214 = arith.mulf %212, %213 : vector<1x16xf32>
    %215 = arith.mulf %209, %209 : vector<1x16xf32>
    %216 = arith.subf %214, %215 : vector<1x16xf32>
    %217 = vector.broadcast %209 : vector<1x16xf32> to vector<16x16xf32>
    %218 = arith.subf %203, %217 : vector<16x16xf32>
    %cst_62 = arith.constant 9.99999974E-6 : f32
    %219 = vector.broadcast %cst_62 : f32 to vector<1x16xf32>
    %220 = arith.addf %216, %219 : vector<1x16xf32>
    %221 = math.rsqrt %220 : vector<1x16xf32>
    %222 = vector.broadcast %221 : vector<1x16xf32> to vector<16x16xf32>
    %223 = arith.mulf %218, %222 : vector<16x16xf32>
    %224 = vector.broadcast %204 : vector<1x16xf32> to vector<16x16xf32>
    %225 = arith.mulf %223, %224 : vector<16x16xf32>
    %226 = vector.broadcast %205 : vector<1x16xf32> to vector<16x16xf32>
    %227 = arith.addf %225, %226 : vector<16x16xf32>
    %228 = vector.extract_strided_slice %5 {offsets = [64, 0], sizes = [16, 16], strides = [1, 1]} : vector<144x16xf32> to vector<16x16xf32>
    %cst_63 = arith.constant dense<0.000000e+00> : vector<16x16xf32>
    %229 = tpu.matmul %227, %228, %cst_63 {dimension_numbers = #tpu.dot_dimension_numbers<[1], [0], [0], [1], [0, 0, 1, 1], [], []>} : vector<16x16xf32>, vector<16x16xf32>, vector<16x16xf32> -> vector<16x16xf32>
    %cst_64 = arith.constant dense<0.000000e+00> : vector<16x16xf32>
    %230 = tpu.matmul %2, %227, %cst_64 {dimension_numbers = #tpu.dot_dimension_numbers<[1], [0], [0], [1], [0, 0, 1, 1], [], []>} : vector<16x16xf32>, vector<16x16xf32>, vector<16x16xf32> -> vector<16x16xf32>
    %231 = arith.addf %230, %196 : vector<16x16xf32>
    %232 = vector.extract_strided_slice %5 {offsets = [32, 0], sizes = [16, 16], strides = [1, 1]} : vector<144x16xf32> to vector<16x16xf32>
    %cst_65 = arith.constant dense<0.000000e+00> : vector<16x16xf32>
    %233 = tpu.matmul %231, %232, %cst_65 {dimension_numbers = #tpu.dot_dimension_numbers<[1], [0], [0], [1], [0, 0, 1, 1], [], []>} : vector<16x16xf32>, vector<16x16xf32>, vector<16x16xf32> -> vector<16x16xf32>
    %234 = vector.extract_strided_slice %6 {offsets = [7, 0], sizes = [1, 16], strides = [1, 1]} : vector<24x16xf32> to vector<1x16xf32>
    %235 = vector.broadcast %234 : vector<1x16xf32> to vector<16x16xf32>
    %236 = arith.addf %233, %235 : vector<16x16xf32>
    %237 = vector.extract_strided_slice %6 {offsets = [10, 0], sizes = [1, 16], strides = [1, 1]} : vector<24x16xf32> to vector<1x16xf32>
    %238 = vector.extract_strided_slice %6 {offsets = [13, 0], sizes = [1, 16], strides = [1, 1]} : vector<24x16xf32> to vector<1x16xf32>
    %cst_66 = arith.constant dense<0.000000e+00> : vector<16xf32>
    %239 = vector.multi_reduction <add>, %236, %cst_66 [0] : vector<16x16xf32> to vector<16xf32>
    %240 = vector.shape_cast %239 : vector<16xf32> to vector<1x16xf32>
    %cst_67 = arith.constant 6.250000e-02 : f32
    %241 = vector.broadcast %cst_67 : f32 to vector<1x16xf32>
    %242 = arith.mulf %240, %241 : vector<1x16xf32>
    %243 = arith.mulf %236, %236 : vector<16x16xf32>
    %cst_68 = arith.constant dense<0.000000e+00> : vector<16xf32>
    %244 = vector.multi_reduction <add>, %243, %cst_68 [0] : vector<16x16xf32> to vector<16xf32>
    %245 = vector.shape_cast %244 : vector<16xf32> to vector<1x16xf32>
    %cst_69 = arith.constant 6.250000e-02 : f32
    %246 = vector.broadcast %cst_69 : f32 to vector<1x16xf32>
    %247 = arith.mulf %245, %246 : vector<1x16xf32>
    %248 = arith.mulf %242, %242 : vector<1x16xf32>
    %249 = arith.subf %247, %248 : vector<1x16xf32>
    %250 = vector.broadcast %242 : vector<1x16xf32> to vector<16x16xf32>
    %251 = arith.subf %236, %250 : vector<16x16xf32>
    %cst_70 = arith.constant 9.99999974E-6 : f32
    %252 = vector.broadcast %cst_70 : f32 to vector<1x16xf32>
    %253 = arith.addf %249, %252 : vector<1x16xf32>
    %254 = math.rsqrt %253 : vector<1x16xf32>
    %255 = vector.broadcast %254 : vector<1x16xf32> to vector<16x16xf32>
    %256 = arith.mulf %251, %255 : vector<16x16xf32>
    %257 = vector.broadcast %237 : vector<1x16xf32> to vector<16x16xf32>
    %258 = arith.mulf %256, %257 : vector<16x16xf32>
    %259 = vector.broadcast %238 : vector<1x16xf32> to vector<16x16xf32>
    %260 = arith.addf %258, %259 : vector<16x16xf32>
    %261 = vector.extract_strided_slice %5 {offsets = [80, 0], sizes = [16, 16], strides = [1, 1]} : vector<144x16xf32> to vector<16x16xf32>
    %cst_71 = arith.constant dense<0.000000e+00> : vector<16x16xf32>
    %262 = tpu.matmul %260, %261, %cst_71 {dimension_numbers = #tpu.dot_dimension_numbers<[1], [0], [0], [1], [0, 0, 1, 1], [], []>} : vector<16x16xf32>, vector<16x16xf32>, vector<16x16xf32> -> vector<16x16xf32>
    %263 = arith.addf %229, %262 : vector<16x16xf32>
    %cst_72 = arith.constant dense<0.000000e+00> : vector<16x16xf32>
    %264 = tpu.matmul %2, %260, %cst_72 {dimension_numbers = #tpu.dot_dimension_numbers<[1], [0], [0], [1], [0, 0, 1, 1], [], []>} : vector<16x16xf32>, vector<16x16xf32>, vector<16x16xf32> -> vector<16x16xf32>
    %265 = arith.addf %264, %196 : vector<16x16xf32>
    %266 = vector.extract_strided_slice %5 {offsets = [48, 0], sizes = [16, 16], strides = [1, 1]} : vector<144x16xf32> to vector<16x16xf32>
    %cst_73 = arith.constant dense<0.000000e+00> : vector<16x16xf32>
    %267 = tpu.matmul %265, %266, %cst_73 {dimension_numbers = #tpu.dot_dimension_numbers<[1], [0], [0], [1], [0, 0, 1, 1], [], []>} : vector<16x16xf32>, vector<16x16xf32>, vector<16x16xf32> -> vector<16x16xf32>
    %268 = vector.extract_strided_slice %6 {offsets = [8, 0], sizes = [1, 16], strides = [1, 1]} : vector<24x16xf32> to vector<1x16xf32>
    %269 = vector.broadcast %268 : vector<1x16xf32> to vector<16x16xf32>
    %270 = arith.addf %267, %269 : vector<16x16xf32>
    %271 = vector.extract_strided_slice %6 {offsets = [11, 0], sizes = [1, 16], strides = [1, 1]} : vector<24x16xf32> to vector<1x16xf32>
    %272 = vector.extract_strided_slice %6 {offsets = [14, 0], sizes = [1, 16], strides = [1, 1]} : vector<24x16xf32> to vector<1x16xf32>
    %cst_74 = arith.constant dense<0.000000e+00> : vector<16xf32>
    %273 = vector.multi_reduction <add>, %270, %cst_74 [0] : vector<16x16xf32> to vector<16xf32>
    %274 = vector.shape_cast %273 : vector<16xf32> to vector<1x16xf32>
    %cst_75 = arith.constant 6.250000e-02 : f32
    %275 = vector.broadcast %cst_75 : f32 to vector<1x16xf32>
    %276 = arith.mulf %274, %275 : vector<1x16xf32>
    %277 = arith.mulf %270, %270 : vector<16x16xf32>
    %cst_76 = arith.constant dense<0.000000e+00> : vector<16xf32>
    %278 = vector.multi_reduction <add>, %277, %cst_76 [0] : vector<16x16xf32> to vector<16xf32>
    %279 = vector.shape_cast %278 : vector<16xf32> to vector<1x16xf32>
    %cst_77 = arith.constant 6.250000e-02 : f32
    %280 = vector.broadcast %cst_77 : f32 to vector<1x16xf32>
    %281 = arith.mulf %279, %280 : vector<1x16xf32>
    %282 = arith.mulf %276, %276 : vector<1x16xf32>
    %283 = arith.subf %281, %282 : vector<1x16xf32>
    %284 = vector.broadcast %276 : vector<1x16xf32> to vector<16x16xf32>
    %285 = arith.subf %270, %284 : vector<16x16xf32>
    %cst_78 = arith.constant 9.99999974E-6 : f32
    %286 = vector.broadcast %cst_78 : f32 to vector<1x16xf32>
    %287 = arith.addf %283, %286 : vector<1x16xf32>
    %288 = math.rsqrt %287 : vector<1x16xf32>
    %289 = vector.broadcast %288 : vector<1x16xf32> to vector<16x16xf32>
    %290 = arith.mulf %285, %289 : vector<16x16xf32>
    %291 = vector.broadcast %271 : vector<1x16xf32> to vector<16x16xf32>
    %292 = arith.mulf %290, %291 : vector<16x16xf32>
    %293 = vector.broadcast %272 : vector<1x16xf32> to vector<16x16xf32>
    %294 = arith.addf %292, %293 : vector<16x16xf32>
    %295 = vector.extract_strided_slice %5 {offsets = [96, 0], sizes = [16, 16], strides = [1, 1]} : vector<144x16xf32> to vector<16x16xf32>
    %cst_79 = arith.constant dense<0.000000e+00> : vector<16x16xf32>
    %296 = tpu.matmul %294, %295, %cst_79 {dimension_numbers = #tpu.dot_dimension_numbers<[1], [0], [0], [1], [0, 0, 1, 1], [], []>} : vector<16x16xf32>, vector<16x16xf32>, vector<16x16xf32> -> vector<16x16xf32>
    %297 = arith.addf %263, %296 : vector<16x16xf32>
    %298 = vector.extract_strided_slice %6 {offsets = [15, 0], sizes = [1, 16], strides = [1, 1]} : vector<24x16xf32> to vector<1x16xf32>
    %299 = vector.extract_strided_slice %6 {offsets = [16, 0], sizes = [1, 16], strides = [1, 1]} : vector<24x16xf32> to vector<1x16xf32>
    %cst_80 = arith.constant dense<0.000000e+00> : vector<16xf32>
    %300 = vector.multi_reduction <add>, %297, %cst_80 [0] : vector<16x16xf32> to vector<16xf32>
    %301 = vector.shape_cast %300 : vector<16xf32> to vector<1x16xf32>
    %cst_81 = arith.constant 6.250000e-02 : f32
    %302 = vector.broadcast %cst_81 : f32 to vector<1x16xf32>
    %303 = arith.mulf %301, %302 : vector<1x16xf32>
    %304 = arith.mulf %297, %297 : vector<16x16xf32>
    %cst_82 = arith.constant dense<0.000000e+00> : vector<16xf32>
    %305 = vector.multi_reduction <add>, %304, %cst_82 [0] : vector<16x16xf32> to vector<16xf32>
    %306 = vector.shape_cast %305 : vector<16xf32> to vector<1x16xf32>
    %cst_83 = arith.constant 6.250000e-02 : f32
    %307 = vector.broadcast %cst_83 : f32 to vector<1x16xf32>
    %308 = arith.mulf %306, %307 : vector<1x16xf32>
    %309 = arith.mulf %303, %303 : vector<1x16xf32>
    %310 = arith.subf %308, %309 : vector<1x16xf32>
    %311 = vector.broadcast %303 : vector<1x16xf32> to vector<16x16xf32>
    %312 = arith.subf %297, %311 : vector<16x16xf32>
    %cst_84 = arith.constant 9.99999974E-6 : f32
    %313 = vector.broadcast %cst_84 : f32 to vector<1x16xf32>
    %314 = arith.addf %310, %313 : vector<1x16xf32>
    %315 = math.rsqrt %314 : vector<1x16xf32>
    %316 = vector.broadcast %315 : vector<1x16xf32> to vector<16x16xf32>
    %317 = arith.mulf %312, %316 : vector<16x16xf32>
    %318 = vector.broadcast %298 : vector<1x16xf32> to vector<16x16xf32>
    %319 = arith.mulf %317, %318 : vector<16x16xf32>
    %320 = vector.broadcast %299 : vector<1x16xf32> to vector<16x16xf32>
    %321 = arith.addf %319, %320 : vector<16x16xf32>
    %cst_85 = arith.constant 0.000000e+00 : f32
    %322 = vector.broadcast %cst_85 : f32 to vector<16x16xf32>
    %323 = arith.maximumf %321, %322 : vector<16x16xf32>
    %324 = arith.addf %323, %68 : vector<16x16xf32>
    %cst_86 = arith.constant dense<0.000000e+00> : vector<16x16xf32>
    %325 = tpu.matmul %2, %324, %cst_86 {dimension_numbers = #tpu.dot_dimension_numbers<[1], [0], [0], [1], [0, 0, 1, 1], [], []>} : vector<16x16xf32>, vector<16x16xf32>, vector<16x16xf32> -> vector<16x16xf32>
    %326 = arith.addf %325, %324 : vector<16x16xf32>
    %327 = vector.extract_strided_slice %5 {offsets = [16, 0], sizes = [16, 16], strides = [1, 1]} : vector<144x16xf32> to vector<16x16xf32>
    %cst_87 = arith.constant dense<0.000000e+00> : vector<16x16xf32>
    %328 = tpu.matmul %326, %327, %cst_87 {dimension_numbers = #tpu.dot_dimension_numbers<[1], [0], [0], [1], [0, 0, 1, 1], [], []>} : vector<16x16xf32>, vector<16x16xf32>, vector<16x16xf32> -> vector<16x16xf32>
    %329 = vector.extract_strided_slice %6 {offsets = [6, 0], sizes = [1, 16], strides = [1, 1]} : vector<24x16xf32> to vector<1x16xf32>
    %330 = vector.broadcast %329 : vector<1x16xf32> to vector<16x16xf32>
    %331 = arith.addf %328, %330 : vector<16x16xf32>
    %332 = vector.extract_strided_slice %6 {offsets = [9, 0], sizes = [1, 16], strides = [1, 1]} : vector<24x16xf32> to vector<1x16xf32>
    %333 = vector.extract_strided_slice %6 {offsets = [12, 0], sizes = [1, 16], strides = [1, 1]} : vector<24x16xf32> to vector<1x16xf32>
    %cst_88 = arith.constant dense<0.000000e+00> : vector<16xf32>
    %334 = vector.multi_reduction <add>, %331, %cst_88 [0] : vector<16x16xf32> to vector<16xf32>
    %335 = vector.shape_cast %334 : vector<16xf32> to vector<1x16xf32>
    %cst_89 = arith.constant 6.250000e-02 : f32
    %336 = vector.broadcast %cst_89 : f32 to vector<1x16xf32>
    %337 = arith.mulf %335, %336 : vector<1x16xf32>
    %338 = arith.mulf %331, %331 : vector<16x16xf32>
    %cst_90 = arith.constant dense<0.000000e+00> : vector<16xf32>
    %339 = vector.multi_reduction <add>, %338, %cst_90 [0] : vector<16x16xf32> to vector<16xf32>
    %340 = vector.shape_cast %339 : vector<16xf32> to vector<1x16xf32>
    %cst_91 = arith.constant 6.250000e-02 : f32
    %341 = vector.broadcast %cst_91 : f32 to vector<1x16xf32>
    %342 = arith.mulf %340, %341 : vector<1x16xf32>
    %343 = arith.mulf %337, %337 : vector<1x16xf32>
    %344 = arith.subf %342, %343 : vector<1x16xf32>
    %345 = vector.broadcast %337 : vector<1x16xf32> to vector<16x16xf32>
    %346 = arith.subf %331, %345 : vector<16x16xf32>
    %cst_92 = arith.constant 9.99999974E-6 : f32
    %347 = vector.broadcast %cst_92 : f32 to vector<1x16xf32>
    %348 = arith.addf %344, %347 : vector<1x16xf32>
    %349 = math.rsqrt %348 : vector<1x16xf32>
    %350 = vector.broadcast %349 : vector<1x16xf32> to vector<16x16xf32>
    %351 = arith.mulf %346, %350 : vector<16x16xf32>
    %352 = vector.broadcast %332 : vector<1x16xf32> to vector<16x16xf32>
    %353 = arith.mulf %351, %352 : vector<16x16xf32>
    %354 = vector.broadcast %333 : vector<1x16xf32> to vector<16x16xf32>
    %355 = arith.addf %353, %354 : vector<16x16xf32>
    %356 = vector.extract_strided_slice %5 {offsets = [64, 0], sizes = [16, 16], strides = [1, 1]} : vector<144x16xf32> to vector<16x16xf32>
    %cst_93 = arith.constant dense<0.000000e+00> : vector<16x16xf32>
    %357 = tpu.matmul %355, %356, %cst_93 {dimension_numbers = #tpu.dot_dimension_numbers<[1], [0], [0], [1], [0, 0, 1, 1], [], []>} : vector<16x16xf32>, vector<16x16xf32>, vector<16x16xf32> -> vector<16x16xf32>
    %cst_94 = arith.constant dense<0.000000e+00> : vector<16x16xf32>
    %358 = tpu.matmul %2, %355, %cst_94 {dimension_numbers = #tpu.dot_dimension_numbers<[1], [0], [0], [1], [0, 0, 1, 1], [], []>} : vector<16x16xf32>, vector<16x16xf32>, vector<16x16xf32> -> vector<16x16xf32>
    %359 = arith.addf %358, %324 : vector<16x16xf32>
    %360 = vector.extract_strided_slice %5 {offsets = [32, 0], sizes = [16, 16], strides = [1, 1]} : vector<144x16xf32> to vector<16x16xf32>
    %cst_95 = arith.constant dense<0.000000e+00> : vector<16x16xf32>
    %361 = tpu.matmul %359, %360, %cst_95 {dimension_numbers = #tpu.dot_dimension_numbers<[1], [0], [0], [1], [0, 0, 1, 1], [], []>} : vector<16x16xf32>, vector<16x16xf32>, vector<16x16xf32> -> vector<16x16xf32>
    %362 = vector.extract_strided_slice %6 {offsets = [7, 0], sizes = [1, 16], strides = [1, 1]} : vector<24x16xf32> to vector<1x16xf32>
    %363 = vector.broadcast %362 : vector<1x16xf32> to vector<16x16xf32>
    %364 = arith.addf %361, %363 : vector<16x16xf32>
    %365 = vector.extract_strided_slice %6 {offsets = [10, 0], sizes = [1, 16], strides = [1, 1]} : vector<24x16xf32> to vector<1x16xf32>
    %366 = vector.extract_strided_slice %6 {offsets = [13, 0], sizes = [1, 16], strides = [1, 1]} : vector<24x16xf32> to vector<1x16xf32>
    %cst_96 = arith.constant dense<0.000000e+00> : vector<16xf32>
    %367 = vector.multi_reduction <add>, %364, %cst_96 [0] : vector<16x16xf32> to vector<16xf32>
    %368 = vector.shape_cast %367 : vector<16xf32> to vector<1x16xf32>
    %cst_97 = arith.constant 6.250000e-02 : f32
    %369 = vector.broadcast %cst_97 : f32 to vector<1x16xf32>
    %370 = arith.mulf %368, %369 : vector<1x16xf32>
    %371 = arith.mulf %364, %364 : vector<16x16xf32>
    %cst_98 = arith.constant dense<0.000000e+00> : vector<16xf32>
    %372 = vector.multi_reduction <add>, %371, %cst_98 [0] : vector<16x16xf32> to vector<16xf32>
    %373 = vector.shape_cast %372 : vector<16xf32> to vector<1x16xf32>
    %cst_99 = arith.constant 6.250000e-02 : f32
    %374 = vector.broadcast %cst_99 : f32 to vector<1x16xf32>
    %375 = arith.mulf %373, %374 : vector<1x16xf32>
    %376 = arith.mulf %370, %370 : vector<1x16xf32>
    %377 = arith.subf %375, %376 : vector<1x16xf32>
    %378 = vector.broadcast %370 : vector<1x16xf32> to vector<16x16xf32>
    %379 = arith.subf %364, %378 : vector<16x16xf32>
    %cst_100 = arith.constant 9.99999974E-6 : f32
    %380 = vector.broadcast %cst_100 : f32 to vector<1x16xf32>
    %381 = arith.addf %377, %380 : vector<1x16xf32>
    %382 = math.rsqrt %381 : vector<1x16xf32>
    %383 = vector.broadcast %382 : vector<1x16xf32> to vector<16x16xf32>
    %384 = arith.mulf %379, %383 : vector<16x16xf32>
    %385 = vector.broadcast %365 : vector<1x16xf32> to vector<16x16xf32>
    %386 = arith.mulf %384, %385 : vector<16x16xf32>
    %387 = vector.broadcast %366 : vector<1x16xf32> to vector<16x16xf32>
    %388 = arith.addf %386, %387 : vector<16x16xf32>
    %389 = vector.extract_strided_slice %5 {offsets = [80, 0], sizes = [16, 16], strides = [1, 1]} : vector<144x16xf32> to vector<16x16xf32>
    %cst_101 = arith.constant dense<0.000000e+00> : vector<16x16xf32>
    %390 = tpu.matmul %388, %389, %cst_101 {dimension_numbers = #tpu.dot_dimension_numbers<[1], [0], [0], [1], [0, 0, 1, 1], [], []>} : vector<16x16xf32>, vector<16x16xf32>, vector<16x16xf32> -> vector<16x16xf32>
    %391 = arith.addf %357, %390 : vector<16x16xf32>
    %cst_102 = arith.constant dense<0.000000e+00> : vector<16x16xf32>
    %392 = tpu.matmul %2, %388, %cst_102 {dimension_numbers = #tpu.dot_dimension_numbers<[1], [0], [0], [1], [0, 0, 1, 1], [], []>} : vector<16x16xf32>, vector<16x16xf32>, vector<16x16xf32> -> vector<16x16xf32>
    %393 = arith.addf %392, %324 : vector<16x16xf32>
    %394 = vector.extract_strided_slice %5 {offsets = [48, 0], sizes = [16, 16], strides = [1, 1]} : vector<144x16xf32> to vector<16x16xf32>
    %cst_103 = arith.constant dense<0.000000e+00> : vector<16x16xf32>
    %395 = tpu.matmul %393, %394, %cst_103 {dimension_numbers = #tpu.dot_dimension_numbers<[1], [0], [0], [1], [0, 0, 1, 1], [], []>} : vector<16x16xf32>, vector<16x16xf32>, vector<16x16xf32> -> vector<16x16xf32>
    %396 = vector.extract_strided_slice %6 {offsets = [8, 0], sizes = [1, 16], strides = [1, 1]} : vector<24x16xf32> to vector<1x16xf32>
    %397 = vector.broadcast %396 : vector<1x16xf32> to vector<16x16xf32>
    %398 = arith.addf %395, %397 : vector<16x16xf32>
    %399 = vector.extract_strided_slice %6 {offsets = [11, 0], sizes = [1, 16], strides = [1, 1]} : vector<24x16xf32> to vector<1x16xf32>
    %400 = vector.extract_strided_slice %6 {offsets = [14, 0], sizes = [1, 16], strides = [1, 1]} : vector<24x16xf32> to vector<1x16xf32>
    %cst_104 = arith.constant dense<0.000000e+00> : vector<16xf32>
    %401 = vector.multi_reduction <add>, %398, %cst_104 [0] : vector<16x16xf32> to vector<16xf32>
    %402 = vector.shape_cast %401 : vector<16xf32> to vector<1x16xf32>
    %cst_105 = arith.constant 6.250000e-02 : f32
    %403 = vector.broadcast %cst_105 : f32 to vector<1x16xf32>
    %404 = arith.mulf %402, %403 : vector<1x16xf32>
    %405 = arith.mulf %398, %398 : vector<16x16xf32>
    %cst_106 = arith.constant dense<0.000000e+00> : vector<16xf32>
    %406 = vector.multi_reduction <add>, %405, %cst_106 [0] : vector<16x16xf32> to vector<16xf32>
    %407 = vector.shape_cast %406 : vector<16xf32> to vector<1x16xf32>
    %cst_107 = arith.constant 6.250000e-02 : f32
    %408 = vector.broadcast %cst_107 : f32 to vector<1x16xf32>
    %409 = arith.mulf %407, %408 : vector<1x16xf32>
    %410 = arith.mulf %404, %404 : vector<1x16xf32>
    %411 = arith.subf %409, %410 : vector<1x16xf32>
    %412 = vector.broadcast %404 : vector<1x16xf32> to vector<16x16xf32>
    %413 = arith.subf %398, %412 : vector<16x16xf32>
    %cst_108 = arith.constant 9.99999974E-6 : f32
    %414 = vector.broadcast %cst_108 : f32 to vector<1x16xf32>
    %415 = arith.addf %411, %414 : vector<1x16xf32>
    %416 = math.rsqrt %415 : vector<1x16xf32>
    %417 = vector.broadcast %416 : vector<1x16xf32> to vector<16x16xf32>
    %418 = arith.mulf %413, %417 : vector<16x16xf32>
    %419 = vector.broadcast %399 : vector<1x16xf32> to vector<16x16xf32>
    %420 = arith.mulf %418, %419 : vector<16x16xf32>
    %421 = vector.broadcast %400 : vector<1x16xf32> to vector<16x16xf32>
    %422 = arith.addf %420, %421 : vector<16x16xf32>
    %423 = vector.extract_strided_slice %5 {offsets = [96, 0], sizes = [16, 16], strides = [1, 1]} : vector<144x16xf32> to vector<16x16xf32>
    %cst_109 = arith.constant dense<0.000000e+00> : vector<16x16xf32>
    %424 = tpu.matmul %422, %423, %cst_109 {dimension_numbers = #tpu.dot_dimension_numbers<[1], [0], [0], [1], [0, 0, 1, 1], [], []>} : vector<16x16xf32>, vector<16x16xf32>, vector<16x16xf32> -> vector<16x16xf32>
    %425 = arith.addf %391, %424 : vector<16x16xf32>
    %426 = vector.extract_strided_slice %6 {offsets = [15, 0], sizes = [1, 16], strides = [1, 1]} : vector<24x16xf32> to vector<1x16xf32>
    %427 = vector.extract_strided_slice %6 {offsets = [16, 0], sizes = [1, 16], strides = [1, 1]} : vector<24x16xf32> to vector<1x16xf32>
    %cst_110 = arith.constant dense<0.000000e+00> : vector<16xf32>
    %428 = vector.multi_reduction <add>, %425, %cst_110 [0] : vector<16x16xf32> to vector<16xf32>
    %429 = vector.shape_cast %428 : vector<16xf32> to vector<1x16xf32>
    %cst_111 = arith.constant 6.250000e-02 : f32
    %430 = vector.broadcast %cst_111 : f32 to vector<1x16xf32>
    %431 = arith.mulf %429, %430 : vector<1x16xf32>
    %432 = arith.mulf %425, %425 : vector<16x16xf32>
    %cst_112 = arith.constant dense<0.000000e+00> : vector<16xf32>
    %433 = vector.multi_reduction <add>, %432, %cst_112 [0] : vector<16x16xf32> to vector<16xf32>
    %434 = vector.shape_cast %433 : vector<16xf32> to vector<1x16xf32>
    %cst_113 = arith.constant 6.250000e-02 : f32
    %435 = vector.broadcast %cst_113 : f32 to vector<1x16xf32>
    %436 = arith.mulf %434, %435 : vector<1x16xf32>
    %437 = arith.mulf %431, %431 : vector<1x16xf32>
    %438 = arith.subf %436, %437 : vector<1x16xf32>
    %439 = vector.broadcast %431 : vector<1x16xf32> to vector<16x16xf32>
    %440 = arith.subf %425, %439 : vector<16x16xf32>
    %cst_114 = arith.constant 9.99999974E-6 : f32
    %441 = vector.broadcast %cst_114 : f32 to vector<1x16xf32>
    %442 = arith.addf %438, %441 : vector<1x16xf32>
    %443 = math.rsqrt %442 : vector<1x16xf32>
    %444 = vector.broadcast %443 : vector<1x16xf32> to vector<16x16xf32>
    %445 = arith.mulf %440, %444 : vector<16x16xf32>
    %446 = vector.broadcast %426 : vector<1x16xf32> to vector<16x16xf32>
    %447 = arith.mulf %445, %446 : vector<16x16xf32>
    %448 = vector.broadcast %427 : vector<1x16xf32> to vector<16x16xf32>
    %449 = arith.addf %447, %448 : vector<16x16xf32>
    %cst_115 = arith.constant 0.000000e+00 : f32
    %450 = vector.broadcast %cst_115 : f32 to vector<16x16xf32>
    %451 = arith.maximumf %449, %450 : vector<16x16xf32>
    %452 = vector.extract_strided_slice %5 {offsets = [112, 0], sizes = [16, 16], strides = [1, 1]} : vector<144x16xf32> to vector<16x16xf32>
    %cst_116 = arith.constant dense<0.000000e+00> : vector<16x16xf32>
    %453 = tpu.matmul %451, %452, %cst_116 {dimension_numbers = #tpu.dot_dimension_numbers<[1], [0], [0], [1], [0, 0, 1, 1], [], []>} : vector<16x16xf32>, vector<16x16xf32>, vector<16x16xf32> -> vector<16x16xf32>
    %454 = vector.extract_strided_slice %6 {offsets = [17, 0], sizes = [1, 16], strides = [1, 1]} : vector<24x16xf32> to vector<1x16xf32>
    %455 = vector.broadcast %454 : vector<1x16xf32> to vector<16x16xf32>
    %456 = arith.addf %453, %455 : vector<16x16xf32>
    %457 = math.tanh %456 : vector<16x16xf32>
    %458 = vector.extract_strided_slice %6 {offsets = [18, 0], sizes = [1, 16], strides = [1, 1]} : vector<24x16xf32> to vector<1x16xf32>
    %459 = vector.extract_strided_slice %6 {offsets = [19, 0], sizes = [1, 16], strides = [1, 1]} : vector<24x16xf32> to vector<1x16xf32>
    %cst_117 = arith.constant dense<0.000000e+00> : vector<16xf32>
    %460 = vector.multi_reduction <add>, %457, %cst_117 [0] : vector<16x16xf32> to vector<16xf32>
    %461 = vector.shape_cast %460 : vector<16xf32> to vector<1x16xf32>
    %cst_118 = arith.constant 6.250000e-02 : f32
    %462 = vector.broadcast %cst_118 : f32 to vector<1x16xf32>
    %463 = arith.mulf %461, %462 : vector<1x16xf32>
    %464 = arith.mulf %457, %457 : vector<16x16xf32>
    %cst_119 = arith.constant dense<0.000000e+00> : vector<16xf32>
    %465 = vector.multi_reduction <add>, %464, %cst_119 [0] : vector<16x16xf32> to vector<16xf32>
    %466 = vector.shape_cast %465 : vector<16xf32> to vector<1x16xf32>
    %cst_120 = arith.constant 6.250000e-02 : f32
    %467 = vector.broadcast %cst_120 : f32 to vector<1x16xf32>
    %468 = arith.mulf %466, %467 : vector<1x16xf32>
    %469 = arith.mulf %463, %463 : vector<1x16xf32>
    %470 = arith.subf %468, %469 : vector<1x16xf32>
    %471 = vector.broadcast %463 : vector<1x16xf32> to vector<16x16xf32>
    %472 = arith.subf %457, %471 : vector<16x16xf32>
    %cst_121 = arith.constant 9.99999974E-6 : f32
    %473 = vector.broadcast %cst_121 : f32 to vector<1x16xf32>
    %474 = arith.addf %470, %473 : vector<1x16xf32>
    %475 = math.rsqrt %474 : vector<1x16xf32>
    %476 = vector.broadcast %475 : vector<1x16xf32> to vector<16x16xf32>
    %477 = arith.mulf %472, %476 : vector<16x16xf32>
    %478 = vector.broadcast %458 : vector<1x16xf32> to vector<16x16xf32>
    %479 = arith.mulf %477, %478 : vector<16x16xf32>
    %480 = vector.broadcast %459 : vector<1x16xf32> to vector<16x16xf32>
    %481 = arith.addf %479, %480 : vector<16x16xf32>
    %482 = vector.extract_strided_slice %5 {offsets = [128, 0], sizes = [16, 16], strides = [1, 1]} : vector<144x16xf32> to vector<16x16xf32>
    %cst_122 = arith.constant dense<0.000000e+00> : vector<16x16xf32>
    %483 = tpu.matmul %481, %482, %cst_122 {dimension_numbers = #tpu.dot_dimension_numbers<[1], [0], [0], [1], [0, 0, 1, 1], [], []>} : vector<16x16xf32>, vector<16x16xf32>, vector<16x16xf32> -> vector<16x16xf32>
    %484 = vector.extract_strided_slice %483 {offsets = [0, 0], sizes = [16, 4], strides = [1, 1]} : vector<16x16xf32> to vector<16x4xf32>
    %485 = vector.extract_strided_slice %6 {offsets = [20, 0], sizes = [1, 4], strides = [1, 1]} : vector<24x16xf32> to vector<1x4xf32>
    %486 = vector.broadcast %485 : vector<1x4xf32> to vector<16x4xf32>
    %487 = arith.addf %484, %486 : vector<16x4xf32>
    %488 = vector.extract_strided_slice %6 {offsets = [21, 0], sizes = [1, 4], strides = [1, 1]} : vector<24x16xf32> to vector<1x4xf32>
    %489 = vector.extract_strided_slice %6 {offsets = [22, 0], sizes = [1, 4], strides = [1, 1]} : vector<24x16xf32> to vector<1x4xf32>
    %cst_123 = arith.constant dense<0.000000e+00> : vector<4xf32>
    %490 = vector.multi_reduction <add>, %487, %cst_123 [0] : vector<16x4xf32> to vector<4xf32>
    %491 = vector.shape_cast %490 : vector<4xf32> to vector<1x4xf32>
    %cst_124 = arith.constant 6.250000e-02 : f32
    %492 = vector.broadcast %cst_124 : f32 to vector<1x4xf32>
    %493 = arith.mulf %491, %492 : vector<1x4xf32>
    %494 = arith.mulf %487, %487 : vector<16x4xf32>
    %cst_125 = arith.constant dense<0.000000e+00> : vector<4xf32>
    %495 = vector.multi_reduction <add>, %494, %cst_125 [0] : vector<16x4xf32> to vector<4xf32>
    %496 = vector.shape_cast %495 : vector<4xf32> to vector<1x4xf32>
    %cst_126 = arith.constant 6.250000e-02 : f32
    %497 = vector.broadcast %cst_126 : f32 to vector<1x4xf32>
    %498 = arith.mulf %496, %497 : vector<1x4xf32>
    %499 = arith.mulf %493, %493 : vector<1x4xf32>
    %500 = arith.subf %498, %499 : vector<1x4xf32>
    %501 = vector.broadcast %493 : vector<1x4xf32> to vector<16x4xf32>
    %502 = arith.subf %487, %501 : vector<16x4xf32>
    %cst_127 = arith.constant 9.99999974E-6 : f32
    %503 = vector.broadcast %cst_127 : f32 to vector<1x4xf32>
    %504 = arith.addf %500, %503 : vector<1x4xf32>
    %505 = math.rsqrt %504 : vector<1x4xf32>
    %506 = vector.broadcast %505 : vector<1x4xf32> to vector<16x4xf32>
    %507 = arith.mulf %502, %506 : vector<16x4xf32>
    %508 = vector.broadcast %488 : vector<1x4xf32> to vector<16x4xf32>
    %509 = arith.mulf %507, %508 : vector<16x4xf32>
    %510 = vector.broadcast %489 : vector<1x4xf32> to vector<16x4xf32>
    %511 = arith.addf %509, %510 : vector<16x4xf32>
    %cst_128 = arith.constant dense<0xFF800000> : vector<16xf32>
    %512 = vector.multi_reduction <maximumf>, %511, %cst_128 [1] : vector<16x4xf32> to vector<16xf32>
    %cst_129 = arith.constant 0xFF800000 : f32
    %513 = vector.broadcast %cst_129 : f32 to vector<16xf32>
    %514 = arith.maximumf %513, %512 : vector<16xf32>
    %515 = vector.shape_cast %514 : vector<16xf32> to vector<16x1xf32>
    %516 = vector.broadcast %515 : vector<16x1xf32> to vector<16x4xf32>
    %517 = arith.subf %511, %516 : vector<16x4xf32>
    %518 = math.exp %517 : vector<16x4xf32>
    %cst_130 = arith.constant dense<0.000000e+00> : vector<16xf32>
    %519 = vector.multi_reduction <add>, %518, %cst_130 [1] : vector<16x4xf32> to vector<16xf32>
    %520 = vector.shape_cast %519 : vector<16xf32> to vector<16x1xf32>
    %521 = vector.broadcast %520 : vector<16x1xf32> to vector<16x4xf32>
    %522 = arith.divf %518, %521 : vector<16x4xf32>
    %523 = vector.extract_strided_slice %522 {offsets = [0, 0], sizes = [16, 1], strides = [1, 1]} : vector<16x4xf32> to vector<16x1xf32>
    %524 = vector.broadcast %523 : vector<16x1xf32> to vector<16x16xf32>
    %525 = arith.mulf %451, %524 : vector<16x16xf32>
    %526 = vector.extract_strided_slice %522 {offsets = [0, 1], sizes = [16, 1], strides = [1, 1]} : vector<16x4xf32> to vector<16x1xf32>
    %527 = vector.broadcast %526 : vector<16x1xf32> to vector<16x16xf32>
    %528 = arith.mulf %451, %527 : vector<16x16xf32>
    %529 = vector.extract_strided_slice %522 {offsets = [0, 2], sizes = [16, 1], strides = [1, 1]} : vector<16x4xf32> to vector<16x1xf32>
    %530 = vector.broadcast %529 : vector<16x1xf32> to vector<16x16xf32>
    %531 = arith.mulf %451, %530 : vector<16x16xf32>
    %532 = vector.extract_strided_slice %522 {offsets = [0, 3], sizes = [16, 1], strides = [1, 1]} : vector<16x4xf32> to vector<16x1xf32>
    %533 = vector.broadcast %532 : vector<16x1xf32> to vector<16x16xf32>
    %534 = arith.mulf %451, %533 : vector<16x16xf32>
    %535 = tpu.concatenate %525, %528, %531, %534 in 1 : vector<16x16xf32>, vector<16x16xf32>, vector<16x16xf32>, vector<16x16xf32> -> vector<16x64xf32>
    %cst_131 = arith.constant dense<0.000000e+00> : vector<2x64xf32>
    %536 = tpu.matmul %4, %535, %cst_131 {dimension_numbers = #tpu.dot_dimension_numbers<[1], [0], [0], [1], [0, 0, 1, 1], [], []>} : vector<2x16xf32>, vector<16x64xf32>, vector<2x64xf32> -> vector<2x64xf32>
    %cst_132 = arith.constant 0.000000e+00 : f32
    %537 = vector.broadcast %cst_132 : f32 to vector<2x64xf32>
    %538 = arith.maximumf %536, %537 : vector<2x64xf32>
    %c0_133 = arith.constant 0 : index
    %c0_134 = arith.constant 0 : index
    %539 = vector.load %arg7[%c0_133, %c0_134] : memref<2x64xf32, #tpu.memory_space<vmem>>, vector<2x64xf32>
    tpu.vector_store %arg7[%c0_133, %c0_134], %538 {strides = array<i32>} : memref<2x64xf32, #tpu.memory_space<vmem>>, vector<2x64xf32>,
    return
  }
}

</mosaic_0001>

<bundles_post_ra>
// kernel: dagcn_forward.1
= control target key start
LH: loop header
LB: loop body
LE: loop exit
PB: predicated region body
PF: predicated region fallthrough
CT: control target
= control target key end

     0   :  { %vm201_vm0 = vcmask 1045504   ;;  %vm191_vm1 = vcmask 48128   ;;  %v4145_v2 = vmov 0.0   ;;  %vm4146_vm2 = vmmov 0   ;;  %s4781_s0 = inlined_call_operand.vmem [shape: f32[16,8], index: 0, kind: input, shape index: {}]   ;;  %s4782_s1 = inlined_call_operand.vmem [shape: f32[24,6], index: 1, kind: input, shape index: {}]   ;;  %s4783_s2 = inlined_call_operand.vmem [shape: f32[16,16], index: 2, kind: input, shape index: {}]   ;;  %s4784_s3 = inlined_call_operand.vmem [shape: f32[16,24], index: 3, kind: input, shape index: {}]   ;;  %s4785_s4 = inlined_call_operand.vmem [shape: f32[2,16], index: 4, kind: input, shape index: {}]   ;;  %s4786_s5 = inlined_call_operand.vmem [shape: f32[144,16], index: 5, kind: input, shape index: {}]   ;;  %s4787_s6 = inlined_call_operand.vmem [shape: f32[24,16], index: 6, kind: input, shape index: {}]   ;;  %s4788_s7 = inlined_call_operand.hbm [shape: f32[2,64], index: 7, kind: output, shape index: {}]  }
   0x1   :  { %v38_v0 = vld [vmem:[%s4786_s5 + $0x8] sm:$0xff]  ;;  %v29_v1 = vld [vmem:[%s4782_s1] sm:$0xff]  ;;  %3677 = vmatprep.subr.mxu1 %v4145_v2  ;;  %3679 = vmatprep.mubr.msk.f32.mxu1 %vm4146_vm2, %v4145_v2  ;;  %vm62_vm3 = vcmask 64512  }
   0x2   :  { %v37_v3 = vld [vmem:[%s4786_s5] sm:$0xff]  ;;  %3678 = vmatpush3.msk.msra.mxu1 %vm201_vm0, %v38_v0  ;;  %v28_v5 = vld [vmem:[%s4781_s0 + $0x8] sm:$0xff] }
   0x3   :  { %3672 = vmatprep.subr.mxu0 %v37_v3  ;;  %v27_v4 = vld [vmem:[%s4781_s0] sm:$0xff]  ;;  %3680 = vmatmul.mubr.msk.f32.vlgmr.msra.gmra.mrb[0].mxu1 %vm191_vm1, %v29_v1 }
   0x4   :  { %3673 = vmatpush3.msra.mxu0 %v37_v3 }
   0x5   :  { %12 = vsyncpa [#allocation3], 0  ;;  %3682 = vmatprep.mubr.msk.f32.mxu1 %vm4146_vm2, %v4145_v2  ;;  %v30_v6 = vld [vmem:[%s4782_s1 + $0x8] sm:$0xff]  ;;  %3674 = vmatprep.mubr.msk.f32.mxu0 %vm62_vm3, %v27_v4  ;;  %v31_v7 = vld [vmem:[%s4782_s1 + $0x10] sm:$0xff]  ;;  %vm336_vm4 = vcmask 195584   ;;  %v58_v9 = vlaneseq  ;;  %vm144_vm5 = vcmask 130048  }
   0x6   :  { %3675 = vmatmul.mubr.msk.f32.vlgmr.msra.gmra.mrb[0].mxu0 %vm62_vm3, %v28_v5  ;;  %v34_v8 = vld [vmem:[%s4784_s3] sm:$0xff]  ;;  %vm3245_vm6 = vcmask 31744   ;;  %s4152_s13 = smov 32   ;;  %s4154_s0 = smov 48   ;;  %vm3378_vm7 = vcmask 261120   ;;  %vm3381_vm8 = vcmask 392192  }
   0x7   :  { %3683 = vmatmul.mubr.msk.f32.gmra.mrb[2].mxu1 %vm191_vm1, %v30_v6  ;;  %3694 = vmatprep.mubr.msk.f32.mxu0 %vm336_vm4, %v34_v8  ;;  %v4231_v10 = vshrl.u32 %v58_v9, 7  ;;  %v4239_v12 = vld [vmem:[%s4787_s6] sm:$0xff]  ;;  %s4155_s16 = smov [#allocation2]   ;;  %vm3458_vm9 = vcmask 517120  }
   0x8   :  { %3685 = vmatprep.mubr.msk.f32.mxu1 %vm4146_vm2, %v4145_v2  ;;  %s3466_s17 = sshll.u32 %s4155_s16, 4  ;;  %s3467_s17 = int_to_ptr.vmem [resolvable:$true] %s3466_s17 }
   0x9   :  { %v4234_v11 = vsub.s32 3, %v4231_v10  ;;  %v4242_v13 = vsub.s32 0, %v4231_v10  ;;  %s4121_s1 = scalar_lea.vmem %s3467_s17, 32  ;;  %p4126_p1 = scmp.lt.s32.totalorder %s3467_s17, %s3467_s17 }
   0xa   :  { %p4122_p0 = scmp.ne.s32.totalorder %s3467_s17, %s4121_s1  ;;  %p4127_p2 = scmp.lt.s32.totalorder %s4121_s1, %s4121_s1 }
   0xb   :  { %3686 = vmatmul.mubr.msk.f32.gmra.mrb[4].mxu1 %vm191_vm1, %v31_v7  ;;  %v190_v14 = vrot.slane %v4239_v12, %v4234_v11  ;;  %v61_v15 = vrot.slane %v4239_v12, %v4242_v13 }
   0xc   :  { %p4128_p3 = por %p4127_p2, %p4126_p1 }
   0xe   :  { %p4129_p4 = pnand %p4128_p3, %p4122_p0 }
  0xd6   :  { %v271_v16 = vpop.f32.mrb[0].mxu1 }
  0xd7   :  { %v4248_v17 = vadd.f32 %v271_v16, %v190_v14  ;;  %v3681_v18 = vpop.f32.mrb[1].mxu1 }
  0xd9   :  { %v3676_v19 = vpop.f32.mrb[0].mxu0  ;;  %v297_v22 = vmul.f32 %v4248_v17, %v4248_v17  ;;  %v285_v29 = vsel %vm144_vm5, %v4248_v17, 0.0 }
  0xda   :  { %v4250_v20 = vadd.f32 %v3676_v19, %v61_v15  ;;  %v135_v21 = vpop.f32.mrb[1].mxu0  ;;  %v276_v23 = vpop.f32.mrb[2].mxu1 }
  0xdb   :  { %v4254_v24 = vadd.f32 %v135_v21, %v61_v15  ;;  %v4256_v25 = vadd.f32 %v276_v23, %v190_v14  ;;  %v3684_v26 = vpop.f32.mrb[3].mxu1  ;;  %v300_v36 = vsel %vm144_vm5, %v297_v22, 0.0 }
  0xdc   :  { %v146_v27 = vsel %vm144_vm5, %v4250_v20, 0.0  ;;  %v156_v28 = vmul.f32 %v4250_v20, %v4250_v20 }
  0xdd   :  { %v145_v30 = vsel %vm144_vm5, %v4254_v24, 0.0  ;;  %v155_v31 = vmul.f32 %v4254_v24, %v4254_v24  ;;  %v286_v32 = vsel %vm144_vm5, %v4256_v25, 0.0  ;;  %v298_v33 = vmul.f32 %v4256_v25, %v4256_v25 }
  0xde   :  { %v158_v34 = vsel %vm144_vm5, %v156_v28, 0.0  ;;  %v147_v35 = vadd.f32 %v146_v27, %v145_v30  ;;  %v287_v37 = vadd.f32 %v286_v32, %v285_v29  ;;  %v281_v38 = vpop.f32.mrb[4].mxu1 }
  0xdf   :  { %v157_v39 = vsel %vm144_vm5, %v155_v31, 0.0  ;;  %v301_v40 = vsel %vm144_vm5, %v298_v33, 0.0  ;;  %v282_v41 = vadd.f32 %v281_v38, %v190_v14  ;;  %v3687_v42 = vpop.f32.mrb[5].mxu1 }
  0xe0   :  { %v148_v43 = vrot.slane %v147_v35, 4  ;;  %v159_v44 = vadd.f32 %v158_v34, %v157_v39  ;;  %v302_v45 = vadd.f32 %v301_v40, %v300_v36 }
  0xe1   :  { %v288_v46 = vsel %vm144_vm5, %v282_v41, 0.0  ;;  %v299_v47 = vmul.f32 %v282_v41, %v282_v41 }
  0xe2   :  { %v149_v48 = vadd.f32 %v148_v43, %v147_v35  ;;  %v160_v49 = vrot.slane %v159_v44, 4  ;;  %v289_v50 = vadd.f32 %v288_v46, %v287_v37  ;;  %v4286_v35 = vsub.s32 5, %v4231_v10 }
  0xe3   :  { %v303_v51 = vsel %vm144_vm5, %v299_v47, 0.0  ;;  %v35_v47 = vld [vmem:[%s4784_s3 + $0x8] sm:$0xff] }
  0xe4   :  { %v150_v52 = vrot.slane %v149_v48, 2  ;;  %v161_v53 = vadd.f32 %v160_v49, %v159_v44  ;;  %v290_v54 = vrot.slane %v289_v50, 4  ;;  %v304_v55 = vadd.f32 %v303_v51, %v302_v45  ;;  %v4299_v49 = vld [vmem:[%s4783_s2] sm:$0xff]  ;;  %v40_v51 = vld [vmem:[%s4786_s5 + $0x18] sm:$0xff] }
  0xe6   :  { %v151_v56 = vadd.f32 %v150_v52, %v149_v48  ;;  %v162_v57 = vrot.slane %v161_v53, 2  ;;  %v291_v58 = vadd.f32 %v290_v54, %v289_v50  ;;  %v305_v59 = vrot.slane %v304_v55, 4  ;;  %v39_v50 = vld [vmem:[%s4786_s5 + $0x10] sm:$0xff] }
  0xe7   :  { %v4309_v52 = vpack.c.bf16 %v40_v51, %v39_v50  ;;  %v4358_v50 = vld [vmem:[%s4787_s6 + $0x8] sm:$0xff] }
  0xe8   :  { %v152_v60 = vrot.slane %v151_v56, 1  ;;  %v163_v61 = vadd.f32 %v162_v57, %v161_v53  ;;  %v292_v62 = vrot.slane %v291_v58, 2  ;;  %v306_v63 = vadd.f32 %v305_v59, %v304_v55 }
  0xe9   :  { %3916 = vmatprep.subr.bf16.mxu1 %v4309_v52  ;;  %v4314_v53 = vsub.s32 1, %v4231_v10  ;;  %v4319_v55 = vsub.s32 2, %v4231_v10 }
  0xea   :  { %v153_v0 = vadd.f32 %v152_v60, %v151_v56  ;;  %v164_v1 = vrot.slane %v163_v61, 1  ;;  %v293_v3 = vadd.f32 %v292_v62, %v291_v58  ;;  %v307_v4 = vrot.slane %v306_v63, 2  ;;  %3918 = vmatpush3.bf16.msra.mxu1 %v4309_v52 }
  0xeb   :  { %v178_v54 = vrot.slane %v4239_v12, %v4314_v53  ;;  %v184_v57 = vrot.slane %v4239_v12, %v4319_v55  ;;  %v4362_v51 = vrot.slane %v4358_v50, %v4314_v53 }
  0xec   :  { %v154_v5 = vmul.f32 0.0625, %v153_v0  ;;  %v165_v6 = vadd.f32 %v164_v1, %v163_v61  ;;  %v294_v7 = vrot.slane %v293_v3, 1  ;;  %v308_v8 = vadd.f32 %v307_v4, %v306_v63 }
  0xee   :  { %v166_v9 = vmul.f32 0.0625, %v165_v6  ;;  %v167_v14 = vmul.f32 %v154_v5, %v154_v5  ;;  %v169_v15 = vsub.f32 %v4254_v24, %v154_v5  ;;  %v170_v16 = vsub.f32 %v4250_v20, %v154_v5  ;;  %v4332_v5 = vld [vmem:[%s4783_s2 + $0x8] sm:$0xff] }
  0xef   :  { %v295_v18 = vadd.f32 %v294_v7, %v293_v3  ;;  %v309_v19 = vrot.slane %v308_v8, 1  ;;  %v4283_v20 = vsub.s32 4, %v4231_v10 }
  0xf0   :  { %v168_v21 = vsub.f32 %v166_v9, %v167_v14  ;;  %v4343_v14 = vsub.s32 6, %v4231_v10 }
  0xf1   :  { %v296_v22 = vmul.f32 0.041666668, %v295_v18  ;;  %v310_v23 = vadd.f32 %v309_v19, %v308_v8  ;;  %v325_v36 = vrot.slane %v4239_v12, %v4283_v20 }
  0xf2   :  { %v171_v26 = vadd.f32 1e-05, %v168_v21 }
  0xf3   :  { %v311_v27 = vmul.f32 0.041666668, %v310_v23  ;;  %v312_v28 = vmul.f32 %v296_v22, %v296_v22  ;;  %v316_v29 = vsub.f32 %v282_v41, %v296_v22  ;;  %v314_v30 = vsub.f32 %v4248_v17, %v296_v22 }
  0xf4   :  { %v315_v31 = vsub.f32 %v4256_v25, %v296_v22  ;;  %4074 = vrsqrt.f32 %v171_v26  ;;  %v332_v25 = vrot.slane %v4239_v12, %v4286_v35 }
  0xf5   :  { %v313_v32 = vsub.f32 %v311_v27, %v312_v28 }
  0xf7   :  { %v317_v33 = vadd.f32 1e-05, %v313_v32 }
  0xf9   :  { %4076 = vrsqrt.f32 %v317_v33 }
  0xfe   :  { %v4075_v24 = vpop.eup %4074 }
  0xff   :  { %v174_v34 = vmul.f32 %v4075_v24, %v170_v16  ;;  %v173_v48 = vmul.f32 %v4075_v24, %v169_v15  ;;  %v4347_v15 = vrot.slane %v4239_v12, %v4343_v14 }
 0x101   :  { %v180_v56 = vmul.f32 %v178_v54, %v174_v34  ;;  %v179_v58 = vmul.f32 %v178_v54, %v173_v48 }
 0x103   :  { %v4077_v37 = vpop.eup %4076  ;;  %v186_v59 = vadd.f32 %v184_v57, %v180_v56  ;;  %v185_v61 = vadd.f32 %v184_v57, %v179_v58  ;;  %v4366_v56 = vrot.slane %v4358_v50, %v4283_v20 }
 0x104   :  { %v321_v38 = vmul.f32 %v4077_v37, %v316_v29  ;;  %v319_v17 = vmul.f32 %v4077_v37, %v314_v30  ;;  %v320_v39 = vmul.f32 %v4077_v37, %v315_v31 }
 0x106   :  { %v326_v40 = vmul.f32 %v325_v36, %v319_v17  ;;  %v327_v41 = vmul.f32 %v325_v36, %v320_v39  ;;  %v328_v44 = vmul.f32 %v325_v36, %v321_v38 }
 0x108   :  { %v333_v42 = vadd.f32 %v332_v25, %v326_v40  ;;  %v334_v43 = vadd.f32 %v332_v25, %v327_v41  ;;  %v335_v46 = vadd.f32 %v332_v25, %v328_v44 }
 0x10a   :  { %v3907_v45 = vpack.c.bf16 %v334_v43, %v333_v42 }
 0x10c   :  { %3908 = vmatprep.subr.bf16.mxu0 %v3907_v45 }
 0x10d   :  { %3910 = vmatpush3.bf16.msra.mxu0 %v3907_v45 }
 0x10e   :  { %3692 = vmatprep.subr.mxu0 %v335_v46 }
 0x111   :  { %3693 = vmatpush3.msra.mxu0 %v335_v46 }
 0x112   :  { %3695 = vmatmul.mubr.msk.f32.vlgmr.msra.gmra.mrb[2].mxu0 %vm336_vm4, %v35_v47 }
 0x113   :  { %3701 = vmatprep.mubr.msk.f32.mxu0 %vm144_vm5, %v4299_v49 }
 0x1e5   :  { %v3696_v60 = vpop.f32.mrb[2].mxu0 }
 0x1e6   :  { %v419_v62 = vadd.f32 %v3696_v60, %v186_v59  ;;  %v409_v63 = vpop.f32.mrb[3].mxu0 }
 0x1e7   :  { %v418_v0 = vadd.f32 %v409_v63, %v185_v61 }
 0x1e8   :  { %v4323_v1 = vmax.f32 %v419_v62, 0.0 }
 0x1e9   :  { %v4325_v3 = vmax.f32 %v418_v0, 0.0  ;;  %v41_v0 = vld [vmem:[%s4786_s5 + $0x20] sm:$0xff] }
 0x1eb   :  { %v3911_v4 = vpack.c.bf16 %v4323_v1, %v4325_v3 }
 0x1ed   :  { %3912 = vmatprep.subr.bf16.mxu0 %v3911_v4 }
 0x1ee   :  { %3914 = vmatpush3.bf16.msra.mxu0 %v3911_v4  ;;  %v42_v4 = vld [vmem:[%s4786_s5 + $0x28] sm:$0xff] }
 0x1f1   :  { %3702 = vmatmul.mubr.msk.f32.vlgmr.msra.gmra.mrb[4].mxu0 %vm144_vm5, %v4332_v5 }
 0x1f2   :  { %3715 = vmatprep.mubr.msk.f32.mxu0 %vm144_vm5, %v4299_v49 }
 0x2c4   :  { %v3703_v6 = vpop.f32.mrb[4].mxu0 }
 0x2c5   :  { %v494_v7 = vpop.f32.mrb[5].mxu0  ;;  %v500_v9 = vadd.f32 %v3703_v6, %v4323_v1  ;;  %v4386_v6 = vpack.c.bf16 %v42_v4, %v41_v0 }
 0x2c6   :  { %v495_v8 = vadd.f32 %v494_v7, %v4325_v3 }
 0x2c7   :  { %3924 = vmatprep.subr.bf16.mxu1 %v4386_v6 }
 0x2c8   :  { %3708 = vmatprep.mubr.msk.f32.mxu1 %vm144_vm5, %v495_v8 }
 0x2c9   :  { %3709 = vmatmul.mubr.msk.f32.vlgmr.msra.gmra.mrb[6].mxu1 %vm144_vm5, %v500_v9 }
 0x2ca   :  { %3926 = vmatpush3.bf16.msra.mxu1 %v4386_v6 }
 0x39c   :  { %v3710_v16 = vpop.f32.mrb[6].mxu1 }
 0x39d   :  { %v585_v18 = vadd.f32 %v3710_v16, %v4347_v15  ;;  %v579_v19 = vpop.f32.mrb[7].mxu1 }
 0x39e   :  { %v580_v21 = vadd.f32 %v579_v19, %v4347_v15  ;;  %v48_v19 = vld [vmem:[%s4786_s5 + $0x58] sm:$0xff] }
 0x39f   :  { %v589_v22 = vsel %vm144_vm5, %v585_v18, 0.0  ;;  %v599_v23 = vmul.f32 %v585_v18, %v585_v18 }
 0x3a0   :  { %v588_v26 = vsel %vm144_vm5, %v580_v21, 0.0  ;;  %v598_v27 = vmul.f32 %v580_v21, %v580_v21 }
 0x3a1   :  { %v601_v28 = vsel %vm144_vm5, %v599_v23, 0.0  ;;  %v590_v29 = vadd.f32 %v589_v22, %v588_v26  ;;  %v45_v22 = vld [vmem:[%s4786_s5 + $0x40] sm:$0xff]  ;;  %v46_v23 = vld [vmem:[%s4786_s5 + $0x48] sm:$0xff] }
 0x3a2   :  { %v600_v30 = vsel %vm144_vm5, %v598_v27, 0.0  ;;  %v4412_v26 = vpack.c.bf16 %v46_v23, %v45_v22  ;;  %v707_v27 = vsub.s32 7, %v4231_v10 }
 0x3a3   :  { %v591_v31 = vrot.slane %v590_v29, 4  ;;  %v602_v32 = vadd.f32 %v601_v28, %v600_v30 }
 0x3a4   :  { %v4419_v28 = vrot.slane %v4239_v12, %v707_v27 }
 0x3a5   :  { %v592_v33 = vadd.f32 %v591_v31, %v590_v29  ;;  %v603_v24 = vrot.slane %v602_v32, 4 }
 0x3a7   :  { %v593_v34 = vrot.slane %v592_v33, 2  ;;  %v604_v36 = vadd.f32 %v603_v24, %v602_v32 }
 0x3a9   :  { %v594_v37 = vadd.f32 %v593_v34, %v592_v33  ;;  %v605_v38 = vrot.slane %v604_v36, 2 }
 0x3ab   :  { %v595_v17 = vrot.slane %v594_v37, 1  ;;  %v606_v39 = vadd.f32 %v605_v38, %v604_v36 }
 0x3ad   :  { %v596_v25 = vadd.f32 %v595_v17, %v594_v37  ;;  %v607_v40 = vrot.slane %v606_v39, 1 }
 0x3af   :  { %v597_v41 = vmul.f32 0.0625, %v596_v25  ;;  %v608_v42 = vadd.f32 %v607_v40, %v606_v39 }
 0x3b1   :  { %v609_v43 = vmul.f32 0.0625, %v608_v42  ;;  %v610_v44 = vmul.f32 %v597_v41, %v597_v41  ;;  %v612_v45 = vsub.f32 %v580_v21, %v597_v41  ;;  %v613_v46 = vsub.f32 %v585_v18, %v597_v41  ;;  %v47_v18 = vld [vmem:[%s4786_s5 + $0x50] sm:$0xff] }
 0x3b2   :  { %v4402_v21 = vpack.c.bf16 %v48_v19, %v47_v18 }
 0x3b3   :  { %v611_v47 = vsub.f32 %v609_v43, %v610_v44 }
 0x3b5   :  { %v614_v48 = vadd.f32 1e-05, %v611_v47 }
 0x3b7   :  { %4078 = vrsqrt.f32 %v614_v48 }
 0x3c1   :  { %v4079_v54 = vpop.eup %4078 }
 0x3c2   :  { %v616_v57 = vmul.f32 %v4079_v54, %v612_v45  ;;  %v617_v58 = vmul.f32 %v4079_v54, %v613_v46 }
 0x3c4   :  { %v622_v59 = vmul.f32 %v4362_v51, %v616_v57  ;;  %v623_v60 = vmul.f32 %v4362_v51, %v617_v58 }
 0x3c6   :  { %v4371_v61 = vadd.f32 %v4366_v56, %v622_v59  ;;  %v4374_v62 = vadd.f32 %v4366_v56, %v623_v60 }
 0x3c8   :  { %v3919_v63 = vpack.c.bf16 %v4374_v62, %v4371_v61 }
 0x3ca   :  { %3920 = vmatprep.subr.bf16.mxu0 %v3919_v63 }
 0x3cb   :  { %3922 = vmatpush3.bf16.msra.mxu0 %v3919_v63 }
 0x3cc   :  { %3928 = vmatprep.subr.bf16.mxu0 %v4402_v21 }
 0x3ce   :  { %3716 = vmatmul.mubr.msk.f32.vlgmr.msra.gmra.mrb[6].mxu0 %vm144_vm5, %v4332_v5 }
 0x3cf   :  { %3930 = vmatpush3.bf16.msra.mxu0 %v4402_v21 }
 0x3d0   :  { %3932 = vmatprep.subr.bf16.mxu0 %v4412_v26 }
 0x4a1   :  { %v3717_v7 = vpop.f32.mrb[6].mxu0 }
 0x4a2   :  { %v696_v8 = vpop.f32.mrb[7].mxu0  ;;  %v702_v16 = vadd.f32 %v3717_v7, %v4323_v1  ;;  %v4429_v7 = vrot.slane %v4358_v50, %v4319_v55 }
 0x4a3   :  { %v697_v9 = vadd.f32 %v696_v8, %v4325_v3 }
 0x4a5   :  { %3722 = vmatprep.mubr.msk.f32.mxu1 %vm144_vm5, %v697_v9  ;;  %v4433_v9 = vrot.slane %v4358_v50, %v4286_v35 }
 0x4a6   :  { %3723 = vmatmul.mubr.msk.f32.vlgmr.msra.gmra.mrb[8].mxu1 %vm144_vm5, %v702_v16 }
 0x4a7   :  { %3743 = vmatprep.mubr.msk.f32.mxu1 %vm144_vm5, %v4299_v49 }
 0x579   :  { %v3724_v29 = vpop.f32.mrb[8].mxu1 }
 0x57a   :  { %v787_v30 = vadd.f32 %v3724_v29, %v4419_v28  ;;  %v781_v31 = vpop.f32.mrb[9].mxu1 }
 0x57b   :  { %v782_v32 = vadd.f32 %v781_v31, %v4419_v28  ;;  %v43_v31 = vld [vmem:[%s4786_s5 + $0x30] sm:$0xff] }
 0x57c   :  { %v791_v33 = vsel %vm144_vm5, %v787_v30, 0.0  ;;  %v801_v24 = vmul.f32 %v787_v30, %v787_v30 }
 0x57d   :  { %v790_v34 = vsel %vm144_vm5, %v782_v32, 0.0  ;;  %v800_v36 = vmul.f32 %v782_v32, %v782_v32 }
 0x57e   :  { %v803_v37 = vsel %vm144_vm5, %v801_v24, 0.0  ;;  %v792_v38 = vadd.f32 %v791_v33, %v790_v34 }
 0x57f   :  { %v802_v17 = vsel %vm144_vm5, %v800_v36, 0.0  ;;  %v49_v36 = vld [vmem:[%s4786_s5 + $0x60] sm:$0xff] }
 0x580   :  { %v793_v39 = vrot.slane %v792_v38, 4  ;;  %v804_v12 = vadd.f32 %v803_v37, %v802_v17  ;;  %v50_v37 = vld [vmem:[%s4786_s5 + $0x68] sm:$0xff]  ;;  %v4477_v17 = vrot.slane %v4358_v50, %v4242_v13 }
 0x582   :  { %v794_v25 = vadd.f32 %v793_v39, %v792_v38  ;;  %v805_v40 = vrot.slane %v804_v12, 4  ;;  %v4470_v38 = vpack.c.bf16 %v50_v37, %v49_v36  ;;  %v4491_v36 = vrot.slane %v4358_v50, %v4343_v14 }
 0x584   :  { %v795_v41 = vrot.slane %v794_v25, 2  ;;  %v806_v42 = vadd.f32 %v805_v40, %v804_v12 }
 0x586   :  { %v796_v43 = vadd.f32 %v795_v41, %v794_v25  ;;  %v807_v44 = vrot.slane %v806_v42, 2 }
 0x588   :  { %v797_v45 = vrot.slane %v796_v43, 1  ;;  %v808_v46 = vadd.f32 %v807_v44, %v806_v42 }
 0x58a   :  { %v798_v47 = vadd.f32 %v797_v45, %v796_v43  ;;  %v809_v48 = vrot.slane %v808_v46, 1 }
 0x58c   :  { %v799_v54 = vmul.f32 0.0625, %v798_v47  ;;  %v810_v57 = vadd.f32 %v809_v48, %v808_v46 }
 0x58e   :  { %v811_v58 = vmul.f32 0.0625, %v810_v57  ;;  %v812_v59 = vmul.f32 %v799_v54, %v799_v54  ;;  %v814_v60 = vsub.f32 %v782_v32, %v799_v54  ;;  %v815_v63 = vsub.f32 %v787_v30, %v799_v54  ;;  %v44_v32 = vld [vmem:[%s4786_s5 + $0x38] sm:$0xff] }
 0x58f   :  { %v4454_v33 = vpack.c.bf16 %v44_v32, %v43_v31 }
 0x590   :  { %v813_v0 = vsub.f32 %v811_v58, %v812_v59 }
 0x592   :  { %v816_v4 = vadd.f32 1e-05, %v813_v0 }
 0x594   :  { %4080 = vrsqrt.f32 %v816_v4 }
 0x59e   :  { %v4081_v8 = vpop.eup %4080 }
 0x59f   :  { %v818_v16 = vmul.f32 %v4081_v8, %v814_v60  ;;  %v819_v18 = vmul.f32 %v4081_v8, %v815_v63 }
 0x5a1   :  { %v824_v19 = vmul.f32 %v4429_v7, %v818_v16  ;;  %v825_v22 = vmul.f32 %v4429_v7, %v819_v18 }
 0x5a3   :  { %v830_v23 = vadd.f32 %v4433_v9, %v824_v19  ;;  %v831_v29 = vadd.f32 %v4433_v9, %v825_v22 }
 0x5a5   :  { %3729 = vmatprep.mubr.msk.f32.mxu0 %vm144_vm5, %v830_v23  ;;  %v3935_v30 = vpack.c.bf16 %v831_v29, %v830_v23 }
 0x5a6   :  { %3730 = vmatmul.mubr.msk.f32.vlgmr.msra.gmra.mrb[8].mxu0 %vm144_vm5, %v831_v29 }
 0x5a7   :  { %3736 = vmatprep.mubr.msk.f32.mxu0 %vm144_vm5, %v4371_v61  ;;  %3936 = vmatprep.subr.bf16.mxu1 %v3935_v30 }
 0x5a8   :  { %3938 = vmatpush3.bf16.msra.mxu1 %v3935_v30  ;;  %3934 = vmatpush3.bf16.msra.mxu0 %v4412_v26 }
 0x5a9   :  { %3940 = vmatprep.subr.bf16.mxu1 %v4454_v33  ;;  %3944 = vmatprep.subr.bf16.mxu0 %v4470_v38 }
 0x5ab   :  { %3744 = vmatmul.mubr.msk.f32.vlgmr.msra.gmra.mrb[10].mxu1 %vm144_vm5, %v4332_v5 }
 0x5ac   :  { %3942 = vmatpush3.bf16.msra.mxu1 %v4454_v33 }
 0x5ae   :  { %3737 = vmatmul.mubr.msk.f32.vlgmr.msra.gmra.mrb[8].mxu0 %vm144_vm5, %v4374_v62 }
 0x5af   :  { %3946 = vmatpush3.bf16.msra.mxu0 %v4470_v38 }
 0x5b0   :  { %3952 = vmatprep.subr.bf16.mxu0 %v4309_v52 }
 0x67e   :  { %v3745_v61 = vpop.f32.mrb[10].mxu1 }
 0x67f   :  { %v1060_v24 = vpop.f32.mrb[11].mxu1  ;;  %v1066_v62 = vadd.f32 %v3745_v61, %v4323_v1 }
 0x680   :  { %v1061_v34 = vadd.f32 %v1060_v24, %v4325_v3  ;;  %v4487_v24 = vrot.slane %v4358_v50, %v4234_v11 }
 0x682   :  { %3750 = vmatprep.mubr.msk.f32.mxu1 %vm144_vm5, %v1061_v34 }
 0x683   :  { %3751 = vmatmul.mubr.msk.f32.vlgmr.msra.gmra.mrb[12].mxu1 %vm144_vm5, %v1066_v62 }
 0x684   :  { %3764 = vmatprep.mubr.msk.f32.mxu1 %vm144_vm5, %v4299_v49 }
 0x756   :  { %v3752_v39 = vpop.f32.mrb[12].mxu1 }
 0x757   :  { %v1151_v12 = vadd.f32 %v3752_v39, %v4477_v17  ;;  %v1145_v25 = vpop.f32.mrb[13].mxu1 }
 0x758   :  { %v1146_v40 = vadd.f32 %v1145_v25, %v4477_v17 }
 0x759   :  { %v1155_v41 = vsel %vm144_vm5, %v1151_v12, 0.0  ;;  %v1165_v42 = vmul.f32 %v1151_v12, %v1151_v12 }
 0x75a   :  { %v1154_v43 = vsel %vm144_vm5, %v1146_v40, 0.0  ;;  %v1164_v44 = vmul.f32 %v1146_v40, %v1146_v40 }
 0x75b   :  { %v1167_v45 = vsel %vm144_vm5, %v1165_v42, 0.0  ;;  %v1156_v46 = vadd.f32 %v1155_v41, %v1154_v43 }
 0x75c   :  { %v1166_v47 = vsel %vm144_vm5, %v1164_v44, 0.0 }
 0x75d   :  { %v1157_v48 = vrot.slane %v1156_v46, 4  ;;  %v1168_v54 = vadd.f32 %v1167_v45, %v1166_v47 }
 0x75f   :  { %v1158_v57 = vadd.f32 %v1157_v48, %v1156_v46  ;;  %v1169_v58 = vrot.slane %v1168_v54, 4 }
 0x761   :  { %v1159_v59 = vrot.slane %v1158_v57, 2  ;;  %v1170_v60 = vadd.f32 %v1169_v58, %v1168_v54 }
 0x763   :  { %v1160_v63 = vadd.f32 %v1159_v59, %v1158_v57  ;;  %v1171_v0 = vrot.slane %v1170_v60, 2 }
 0x765   :  { %v1161_v4 = vrot.slane %v1160_v63, 1  ;;  %v1172_v8 = vadd.f32 %v1171_v0, %v1170_v60 }
 0x767   :  { %v1162_v16 = vadd.f32 %v1161_v4, %v1160_v63  ;;  %v1173_v18 = vrot.slane %v1172_v8, 1 }
 0x769   :  { %v1163_v19 = vmul.f32 0.0625, %v1162_v16  ;;  %v1174_v22 = vadd.f32 %v1173_v18, %v1172_v8 }
 0x76b   :  { %v1175_v23 = vmul.f32 0.0625, %v1174_v22  ;;  %v1176_v29 = vmul.f32 %v1163_v19, %v1163_v19  ;;  %v1178_v30 = vsub.f32 %v1146_v40, %v1163_v19  ;;  %v1179_v31 = vsub.f32 %v1151_v12, %v1163_v19 }
 0x76d   :  { %v1177_v32 = vsub.f32 %v1175_v23, %v1176_v29 }
 0x76f   :  { %v1180_v61 = vadd.f32 1e-05, %v1177_v32 }
 0x771   :  { %4082 = vrsqrt.f32 %v1180_v61 }
 0x77b   :  { %v4083_v34 = vpop.eup %4082 }
 0x77c   :  { %v1182_v62 = vmul.f32 %v4083_v34, %v1178_v30  ;;  %v1183_v37 = vmul.f32 %v4083_v34, %v1179_v31 }
 0x77e   :  { %v1188_v39 = vmul.f32 %v4487_v24, %v1182_v62  ;;  %v1189_v25 = vmul.f32 %v4487_v24, %v1183_v37  ;;  %v4508_v37 = vld [vmem:[%s4787_s6 + $0x10] sm:$0xff] }
 0x780   :  { %v1194_v12 = vadd.f32 %v4491_v36, %v1188_v39  ;;  %v1195_v40 = vadd.f32 %v4491_v36, %v1189_v25  ;;  %v4513_v39 = vrot.slane %v4358_v50, %v707_v27 }
 0x782   :  { %3757 = vmatprep.mubr.msk.f32.mxu0 %vm144_vm5, %v1194_v12  ;;  %v4517_v12 = vrot.slane %v4508_v37, %v4242_v13 }
 0x783   :  { %3758 = vmatmul.mubr.msk.f32.vlgmr.msra.gmra.mrb[8].mxu0 %vm144_vm5, %v1195_v40 }
 0x784   :  { %3954 = vmatpush3.bf16.msra.mxu0 %v4309_v52 }
 0x785   :  { %3960 = vmatprep.subr.bf16.mxu0 %v4386_v6 }
 0x856   :  { %v3759_v41 = vpop.f32.mrb[8].mxu0 }
 0x857   :  { %v1280_v42 = vsel %vm144_vm5, %v3759_v41, 0.0  ;;  %v1290_v43 = vmul.f32 %v3759_v41, %v3759_v41  ;;  %v1268_v44 = vpop.f32.mrb[9].mxu0 }
 0x858   :  { %v1279_v45 = vsel %vm144_vm5, %v1268_v44, 0.0  ;;  %v1289_v46 = vmul.f32 %v1268_v44, %v1268_v44 }
 0x859   :  { %v1292_v47 = vsel %vm144_vm5, %v1290_v43, 0.0  ;;  %v1281_v48 = vadd.f32 %v1280_v42, %v1279_v45 }
 0x85a   :  { %v1291_v54 = vsel %vm144_vm5, %v1289_v46, 0.0 }
 0x85b   :  { %v1282_v57 = vrot.slane %v1281_v48, 4  ;;  %v1293_v58 = vadd.f32 %v1292_v47, %v1291_v54 }
 0x85d   :  { %v1283_v59 = vadd.f32 %v1282_v57, %v1281_v48  ;;  %v1294_v60 = vrot.slane %v1293_v58, 4 }
 0x85f   :  { %v1284_v63 = vrot.slane %v1283_v59, 2  ;;  %v1295_v0 = vadd.f32 %v1294_v60, %v1293_v58 }
 0x861   :  { %v1285_v4 = vadd.f32 %v1284_v63, %v1283_v59  ;;  %v1296_v8 = vrot.slane %v1295_v0, 2 }
 0x863   :  { %v1286_v16 = vrot.slane %v1285_v4, 1  ;;  %v1297_v18 = vadd.f32 %v1296_v8, %v1295_v0 }
 0x865   :  { %v1287_v19 = vadd.f32 %v1286_v16, %v1285_v4  ;;  %v1298_v22 = vrot.slane %v1297_v18, 1 }
 0x867   :  { %v1288_v23 = vmul.f32 0.0625, %v1287_v19  ;;  %v1299_v29 = vadd.f32 %v1298_v22, %v1297_v18 }
 0x869   :  { %v1300_v30 = vmul.f32 0.0625, %v1299_v29  ;;  %v1301_v31 = vmul.f32 %v1288_v23, %v1288_v23  ;;  %v1303_v32 = vsub.f32 %v1268_v44, %v1288_v23  ;;  %v1304_v61 = vsub.f32 %v3759_v41, %v1288_v23 }
 0x86b   :  { %v1302_v34 = vsub.f32 %v1300_v30, %v1301_v31 }
 0x86d   :  { %v1305_v62 = vadd.f32 1e-05, %v1302_v34 }
 0x86f   :  { %4084 = vrsqrt.f32 %v1305_v62 }
 0x879   :  { %v4085_v25 = vpop.eup %4084 }
 0x87a   :  { %v1307_v40 = vmul.f32 %v4085_v25, %v1303_v32  ;;  %v1308_v41 = vmul.f32 %v4085_v25, %v1304_v61 }
 0x87c   :  { %v1313_v42 = vmul.f32 %v4513_v39, %v1307_v40  ;;  %v1314_v43 = vmul.f32 %v4513_v39, %v1308_v41 }
 0x87e   :  { %v1319_v44 = vadd.f32 %v4517_v12, %v1313_v42  ;;  %v1320_v45 = vadd.f32 %v4517_v12, %v1314_v43 }
 0x880   :  { %v1321_v46 = vmax.f32 %v1319_v44, 0.0  ;;  %v1322_v10 = vmax.f32 %v1320_v45, 0.0 }
 0x882   :  { %v4524_v50 = vadd.f32 %v1321_v46, %v4325_v3  ;;  %v4527_v27 = vadd.f32 %v1322_v10, %v4323_v1 }
 0x884   :  { %v3947_v13 = vpack.c.bf16 %v4527_v27, %v4524_v50 }
 0x886   :  { %3948 = vmatprep.subr.bf16.mxu1 %v3947_v13 }
 0x887   :  { %3950 = vmatpush3.bf16.msra.mxu1 %v3947_v13 }
 0x88a   :  { %3765 = vmatmul.mubr.msk.f32.vlgmr.msra.gmra.mrb[14].mxu1 %vm144_vm5, %v4332_v5 }
 0x88b   :  { %3778 = vmatprep.mubr.msk.f32.mxu1 %vm144_vm5, %v4299_v49 }
 0x95d   :  { %v3766_v47 = vpop.f32.mrb[14].mxu1 }
 0x95e   :  { %v1391_v48 = vpop.f32.mrb[15].mxu1  ;;  %v1397_v57 = vadd.f32 %v3766_v47, %v4527_v27 }
 0x95f   :  { %v1392_v54 = vadd.f32 %v1391_v48, %v4524_v50 }
 0x961   :  { %3771 = vmatprep.mubr.msk.f32.mxu0 %vm144_vm5, %v1392_v54 }
 0x962   :  { %3772 = vmatmul.mubr.msk.f32.vlgmr.msra.gmra.mrb[10].mxu0 %vm144_vm5, %v1397_v57 }
 0x963   :  { %3962 = vmatpush3.bf16.msra.mxu0 %v4386_v6 }
 0xa35   :  { %v3773_v58 = vpop.f32.mrb[10].mxu0 }
 0xa36   :  { %v1478_v59 = vadd.f32 %v3773_v58, %v4347_v15  ;;  %v1472_v60 = vpop.f32.mrb[11].mxu0 }
 0xa37   :  { %v1473_v63 = vadd.f32 %v1472_v60, %v4347_v15 }
 0xa38   :  { %v1482_v0 = vsel %vm144_vm5, %v1478_v59, 0.0  ;;  %v1492_v4 = vmul.f32 %v1478_v59, %v1478_v59 }
 0xa39   :  { %v1481_v8 = vsel %vm144_vm5, %v1473_v63, 0.0  ;;  %v1491_v16 = vmul.f32 %v1473_v63, %v1473_v63 }
 0xa3a   :  { %v1494_v18 = vsel %vm144_vm5, %v1492_v4, 0.0  ;;  %v1483_v19 = vadd.f32 %v1482_v0, %v1481_v8 }
 0xa3b   :  { %v1493_v22 = vsel %vm144_vm5, %v1491_v16, 0.0 }
 0xa3c   :  { %v1484_v23 = vrot.slane %v1483_v19, 4  ;;  %v1495_v29 = vadd.f32 %v1494_v18, %v1493_v22 }
 0xa3e   :  { %v1485_v30 = vadd.f32 %v1484_v23, %v1483_v19  ;;  %v1496_v31 = vrot.slane %v1495_v29, 4 }
 0xa40   :  { %v1486_v32 = vrot.slane %v1485_v30, 2  ;;  %v1497_v61 = vadd.f32 %v1496_v31, %v1495_v29 }
 0xa42   :  { %v1487_v34 = vadd.f32 %v1486_v32, %v1485_v30  ;;  %v1498_v62 = vrot.slane %v1497_v61, 2 }
 0xa44   :  { %v1488_v25 = vrot.slane %v1487_v34, 1  ;;  %v1499_v40 = vadd.f32 %v1498_v62, %v1497_v61 }
 0xa46   :  { %v1489_v41 = vadd.f32 %v1488_v25, %v1487_v34  ;;  %v1500_v42 = vrot.slane %v1499_v40, 1 }
 0xa48   :  { %v1490_v43 = vmul.f32 0.0625, %v1489_v41  ;;  %v1501_v44 = vadd.f32 %v1500_v42, %v1499_v40 }
 0xa4a   :  { %v1502_v45 = vmul.f32 0.0625, %v1501_v44  ;;  %v1503_v46 = vmul.f32 %v1490_v43, %v1490_v43  ;;  %v1505_v10 = vsub.f32 %v1473_v63, %v1490_v43  ;;  %v1506_v13 = vsub.f32 %v1478_v59, %v1490_v43 }
 0xa4c   :  { %v1504_v47 = vsub.f32 %v1502_v45, %v1503_v46 }
 0xa4e   :  { %v1507_v48 = vadd.f32 1e-05, %v1504_v47 }
 0xa50   :  { %4086 = vrsqrt.f32 %v1507_v48 }
 0xa5a   :  { %v4087_v54 = vpop.eup %4086 }
 0xa5b   :  { %v1509_v57 = vmul.f32 %v4087_v54, %v1505_v10  ;;  %v1510_v58 = vmul.f32 %v4087_v54, %v1506_v13 }
 0xa5d   :  { %v1511_v60 = vmul.f32 %v1509_v57, %v4362_v51  ;;  %v1512_v0 = vmul.f32 %v1510_v58, %v4362_v51 }
 0xa5f   :  { %v1513_v4 = vadd.f32 %v1511_v60, %v4366_v56  ;;  %v4550_v8 = vadd.f32 %v1512_v0, %v4366_v56 }
 0xa61   :  { %v3955_v16 = vpack.c.bf16 %v4550_v8, %v1513_v4 }
 0xa63   :  { %3956 = vmatprep.subr.bf16.mxu1 %v3955_v16 }
 0xa64   :  { %3958 = vmatpush3.bf16.msra.mxu1 %v3955_v16 }
 0xa65   :  { %3964 = vmatprep.subr.bf16.mxu1 %v4402_v21 }
 0xa67   :  { %3779 = vmatmul.mubr.msk.f32.vlgmr.msra.gmra.mrb[16].mxu1 %vm144_vm5, %v4332_v5 }
 0xa68   :  { %3966 = vmatpush3.bf16.msra.mxu1 %v4402_v21 }
 0xa69   :  { %3968 = vmatprep.subr.bf16.mxu1 %v4412_v26 }
 0xb3a   :  { %v3780_v59 = vpop.f32.mrb[16].mxu1 }
 0xb3b   :  { %v1581_v63 = vpop.f32.mrb[17].mxu1  ;;  %v1587_v19 = vadd.f32 %v3780_v59, %v4527_v27 }
 0xb3c   :  { %v1582_v18 = vadd.f32 %v1581_v63, %v4524_v50 }
 0xb3e   :  { %3785 = vmatprep.mubr.msk.f32.mxu0 %vm144_vm5, %v1582_v18 }
 0xb3f   :  { %3786 = vmatmul.mubr.msk.f32.vlgmr.msra.gmra.mrb[12].mxu0 %vm144_vm5, %v1587_v19 }
 0xb40   :  { %3806 = vmatprep.mubr.msk.f32.mxu0 %vm144_vm5, %v4299_v49 }
 0xc12   :  { %v3787_v22 = vpop.f32.mrb[12].mxu0 }
 0xc13   :  { %v1668_v23 = vadd.f32 %v3787_v22, %v4419_v28  ;;  %v1662_v29 = vpop.f32.mrb[13].mxu0 }
 0xc14   :  { %v1663_v30 = vadd.f32 %v1662_v29, %v4419_v28 }
 0xc15   :  { %v1672_v31 = vsel %vm144_vm5, %v1668_v23, 0.0  ;;  %v1682_v32 = vmul.f32 %v1668_v23, %v1668_v23 }
 0xc16   :  { %v1671_v61 = vsel %vm144_vm5, %v1663_v30, 0.0  ;;  %v1681_v34 = vmul.f32 %v1663_v30, %v1663_v30 }
 0xc17   :  { %v1684_v62 = vsel %vm144_vm5, %v1682_v32, 0.0  ;;  %v1673_v25 = vadd.f32 %v1672_v31, %v1671_v61 }
 0xc18   :  { %v1683_v40 = vsel %vm144_vm5, %v1681_v34, 0.0 }
 0xc19   :  { %v1674_v41 = vrot.slane %v1673_v25, 4  ;;  %v1685_v42 = vadd.f32 %v1684_v62, %v1683_v40 }
 0xc1b   :  { %v1675_v43 = vadd.f32 %v1674_v41, %v1673_v25  ;;  %v1686_v44 = vrot.slane %v1685_v42, 4 }
 0xc1d   :  { %v1676_v45 = vrot.slane %v1675_v43, 2  ;;  %v1687_v46 = vadd.f32 %v1686_v44, %v1685_v42 }
 0xc1f   :  { %v1677_v10 = vadd.f32 %v1676_v45, %v1675_v43  ;;  %v1688_v13 = vrot.slane %v1687_v46, 2 }
 0xc21   :  { %v1678_v47 = vrot.slane %v1677_v10, 1  ;;  %v1689_v48 = vadd.f32 %v1688_v13, %v1687_v46 }
 0xc23   :  { %v1679_v54 = vadd.f32 %v1678_v47, %v1677_v10  ;;  %v1690_v57 = vrot.slane %v1689_v48, 1 }
 0xc25   :  { %v1680_v58 = vmul.f32 0.0625, %v1679_v54  ;;  %v1691_v60 = vadd.f32 %v1690_v57, %v1689_v48 }
 0xc27   :  { %v1692_v0 = vmul.f32 0.0625, %v1691_v60  ;;  %v1693_v16 = vmul.f32 %v1680_v58, %v1680_v58  ;;  %v1695_v59 = vsub.f32 %v1663_v30, %v1680_v58  ;;  %v1696_v63 = vsub.f32 %v1668_v23, %v1680_v58 }
 0xc29   :  { %v1694_v18 = vsub.f32 %v1692_v0, %v1693_v16 }
 0xc2b   :  { %v1697_v19 = vadd.f32 1e-05, %v1694_v18 }
 0xc2d   :  { %4088 = vrsqrt.f32 %v1697_v19 }
 0xc37   :  { %v4089_v22 = vpop.eup %4088 }
 0xc38   :  { %v1699_v29 = vmul.f32 %v4089_v22, %v1695_v59  ;;  %v1700_v31 = vmul.f32 %v4089_v22, %v1696_v63 }
 0xc3a   :  { %v1701_v32 = vmul.f32 %v1699_v29, %v4429_v7  ;;  %v1702_v61 = vmul.f32 %v1700_v31, %v4429_v7 }
 0xc3c   :  { %v1703_v34 = vadd.f32 %v1701_v32, %v4433_v9  ;;  %v1704_v62 = vadd.f32 %v1702_v61, %v4433_v9 }
 0xc3e   :  { %3792 = vmatprep.mubr.msk.f32.mxu1 %vm144_vm5, %v1703_v34  ;;  %v3971_v25 = vpack.c.bf16 %v1704_v62, %v1703_v34 }
 0xc3f   :  { %3793 = vmatmul.mubr.msk.f32.vlgmr.msra.gmra.mrb[18].mxu1 %vm144_vm5, %v1704_v62 }
 0xc40   :  { %3799 = vmatprep.mubr.msk.f32.mxu1 %vm144_vm5, %v1513_v4  ;;  %3972 = vmatprep.subr.bf16.mxu0 %v3971_v25 }
 0xc41   :  { %3974 = vmatpush3.bf16.msra.mxu0 %v3971_v25  ;;  %3970 = vmatpush3.bf16.msra.mxu1 %v4412_v26 }
 0xc42   :  { %3976 = vmatprep.subr.bf16.mxu0 %v4454_v33  ;;  %3980 = vmatprep.subr.bf16.mxu1 %v4470_v38 }
 0xc44   :  { %3807 = vmatmul.mubr.msk.f32.vlgmr.msra.gmra.mrb[14].mxu0 %vm144_vm5, %v4332_v5 }
 0xc45   :  { %3978 = vmatpush3.bf16.msra.mxu0 %v4454_v33 }
 0xc47   :  { %3800 = vmatmul.mubr.msk.f32.vlgmr.msra.gmra.mrb[18].mxu1 %vm144_vm5, %v4550_v8 }
 0xc48   :  { %3982 = vmatpush3.bf16.msra.mxu1 %v4470_v38 }
 0xc49   :  { %3988 = vmatprep.subr.bf16.mxu1 %v4309_v52 }
 0xd17   :  { %v3808_v4 = vpop.f32.mrb[14].mxu0 }
 0xd18   :  { %v1933_v23 = vpop.f32.mrb[15].mxu0  ;;  %v1939_v40 = vadd.f32 %v3808_v4, %v4527_v27 }
 0xd19   :  { %v1934_v30 = vadd.f32 %v1933_v23, %v4524_v50 }
 0xd1b   :  { %3813 = vmatprep.mubr.msk.f32.mxu0 %vm144_vm5, %v1934_v30 }
 0xd1c   :  { %3814 = vmatmul.mubr.msk.f32.vlgmr.msra.gmra.mrb[16].mxu0 %vm144_vm5, %v1939_v40 }
 0xd1d   :  { %3827 = vmatprep.mubr.msk.f32.mxu0 %vm144_vm5, %v4299_v49 }
 0xdef   :  { %v3815_v41 = vpop.f32.mrb[16].mxu0 }
 0xdf0   :  { %v2020_v8 = vadd.f32 %v3815_v41, %v4477_v17  ;;  %v2014_v42 = vpop.f32.mrb[17].mxu0 }
 0xdf1   :  { %v2015_v43 = vadd.f32 %v2014_v42, %v4477_v17 }
 0xdf2   :  { %v2024_v44 = vsel %vm144_vm5, %v2020_v8, 0.0  ;;  %v2034_v45 = vmul.f32 %v2020_v8, %v2020_v8 }
 0xdf3   :  { %v2023_v50 = vsel %vm144_vm5, %v2015_v43, 0.0  ;;  %v2033_v46 = vmul.f32 %v2015_v43, %v2015_v43 }
 0xdf4   :  { %v2036_v27 = vsel %vm144_vm5, %v2034_v45, 0.0  ;;  %v2025_v10 = vadd.f32 %v2024_v44, %v2023_v50 }
 0xdf5   :  { %v2035_v13 = vsel %vm144_vm5, %v2033_v46, 0.0 }
 0xdf6   :  { %v2026_v47 = vrot.slane %v2025_v10, 4  ;;  %v2037_v48 = vadd.f32 %v2036_v27, %v2035_v13 }
 0xdf8   :  { %v2027_v54 = vadd.f32 %v2026_v47, %v2025_v10  ;;  %v2038_v57 = vrot.slane %v2037_v48, 4 }
 0xdfa   :  { %v2028_v58 = vrot.slane %v2027_v54, 2  ;;  %v2039_v60 = vadd.f32 %v2038_v57, %v2037_v48 }
 0xdfc   :  { %v2029_v0 = vadd.f32 %v2028_v58, %v2027_v54  ;;  %v2040_v16 = vrot.slane %v2039_v60, 2 }
 0xdfe   :  { %v2030_v59 = vrot.slane %v2029_v0, 1  ;;  %v2041_v63 = vadd.f32 %v2040_v16, %v2039_v60 }
 0xe00   :  { %v2031_v18 = vadd.f32 %v2030_v59, %v2029_v0  ;;  %v2042_v19 = vrot.slane %v2041_v63, 1 }
 0xe02   :  { %v2032_v22 = vmul.f32 0.0625, %v2031_v18  ;;  %v2043_v29 = vadd.f32 %v2042_v19, %v2041_v63 }
 0xe04   :  { %v2044_v31 = vmul.f32 0.0625, %v2043_v29  ;;  %v2045_v32 = vmul.f32 %v2032_v22, %v2032_v22  ;;  %v2047_v61 = vsub.f32 %v2015_v43, %v2032_v22  ;;  %v2048_v34 = vsub.f32 %v2020_v8, %v2032_v22 }
 0xe06   :  { %v2046_v62 = vsub.f32 %v2044_v31, %v2045_v32 }
 0xe08   :  { %v2049_v25 = vadd.f32 1e-05, %v2046_v62 }
 0xe0a   :  { %4090 = vrsqrt.f32 %v2049_v25 }
 0xe14   :  { %v4091_v4 = vpop.eup %4090 }
 0xe15   :  { %v2051_v23 = vmul.f32 %v4091_v4, %v2047_v61  ;;  %v2052_v30 = vmul.f32 %v4091_v4, %v2048_v34 }
 0xe17   :  { %v2053_v40 = vmul.f32 %v2051_v23, %v4487_v24  ;;  %v2054_v41 = vmul.f32 %v2052_v30, %v4487_v24 }
 0xe19   :  { %v2055_v42 = vadd.f32 %v2053_v40, %v4491_v36  ;;  %v2056_v44 = vadd.f32 %v2054_v41, %v4491_v36 }
 0xe1b   :  { %3820 = vmatprep.mubr.msk.f32.mxu1 %vm144_vm5, %v2055_v42 }
 0xe1c   :  { %3821 = vmatmul.mubr.msk.f32.vlgmr.msra.gmra.mrb[18].mxu1 %vm144_vm5, %v2056_v44 }
 0xe1d   :  { %3990 = vmatpush3.bf16.msra.mxu1 %v4309_v52 }
 0xe1e   :  { %3996 = vmatprep.subr.bf16.mxu1 %v4386_v6 }
 0xeef   :  { %v3822_v8 = vpop.f32.mrb[18].mxu1 }
 0xef0   :  { %v2141_v43 = vsel %vm144_vm5, %v3822_v8, 0.0  ;;  %v2151_v45 = vmul.f32 %v3822_v8, %v3822_v8  ;;  %v2129_v50 = vpop.f32.mrb[19].mxu1 }
 0xef1   :  { %v2140_v46 = vsel %vm144_vm5, %v2129_v50, 0.0  ;;  %v2150_v27 = vmul.f32 %v2129_v50, %v2129_v50 }
 0xef2   :  { %v2153_v10 = vsel %vm144_vm5, %v2151_v45, 0.0  ;;  %v2142_v13 = vadd.f32 %v2141_v43, %v2140_v46 }
 0xef3   :  { %v2152_v47 = vsel %vm144_vm5, %v2150_v27, 0.0 }
 0xef4   :  { %v2143_v48 = vrot.slane %v2142_v13, 4  ;;  %v2154_v54 = vadd.f32 %v2153_v10, %v2152_v47 }
 0xef6   :  { %v2144_v57 = vadd.f32 %v2143_v48, %v2142_v13  ;;  %v2155_v58 = vrot.slane %v2154_v54, 4 }
 0xef8   :  { %v2145_v52 = vrot.slane %v2144_v57, 2  ;;  %v2156_v60 = vadd.f32 %v2155_v58, %v2154_v54 }
 0xefa   :  { %v2146_v0 = vadd.f32 %v2145_v52, %v2144_v57  ;;  %v2157_v16 = vrot.slane %v2156_v60, 2 }
 0xefc   :  { %v2147_v59 = vrot.slane %v2146_v0, 1  ;;  %v2158_v63 = vadd.f32 %v2157_v16, %v2156_v60 }
 0xefe   :  { %v2148_v18 = vadd.f32 %v2147_v59, %v2146_v0  ;;  %v2159_v19 = vrot.slane %v2158_v63, 1 }
 0xf00   :  { %v2149_v22 = vmul.f32 0.0625, %v2148_v18  ;;  %v2160_v29 = vadd.f32 %v2159_v19, %v2158_v63 }
 0xf02   :  { %v2161_v31 = vmul.f32 0.0625, %v2160_v29  ;;  %v2162_v32 = vmul.f32 %v2149_v22, %v2149_v22  ;;  %v2164_v61 = vsub.f32 %v2129_v50, %v2149_v22  ;;  %v2165_v34 = vsub.f32 %v3822_v8, %v2149_v22 }
 0xf04   :  { %v2163_v62 = vsub.f32 %v2161_v31, %v2162_v32 }
 0xf06   :  { %v2166_v25 = vadd.f32 1e-05, %v2163_v62 }
 0xf08   :  { %4092 = vrsqrt.f32 %v2166_v25 }
 0xf12   :  { %v4093_v4 = vpop.eup %4092 }
 0xf13   :  { %v2168_v23 = vmul.f32 %v4093_v4, %v2164_v61  ;;  %v2169_v30 = vmul.f32 %v4093_v4, %v2165_v34 }
 0xf15   :  { %v2170_v40 = vmul.f32 %v2168_v23, %v4513_v39  ;;  %v2171_v41 = vmul.f32 %v2169_v30, %v4513_v39 }
 0xf17   :  { %v2172_v42 = vadd.f32 %v2170_v40, %v4517_v12  ;;  %v2173_v44 = vadd.f32 %v2171_v41, %v4517_v12 }
 0xf19   :  { %v2174_v43 = vmax.f32 %v2172_v42, 0.0  ;;  %v2175_v45 = vmax.f32 %v2173_v44, 0.0 }
 0xf1b   :  { %v4616_v46 = vadd.f32 %v2174_v43, %v4325_v3  ;;  %v4619_v8 = vadd.f32 %v2175_v45, %v4323_v1 }
 0xf1d   :  { %v3983_v50 = vpack.c.bf16 %v4619_v8, %v4616_v46 }
 0xf1f   :  { %3984 = vmatprep.subr.bf16.mxu0 %v3983_v50 }
 0xf20   :  { %3986 = vmatpush3.bf16.msra.mxu0 %v3983_v50 }
 0xf23   :  { %3828 = vmatmul.mubr.msk.f32.vlgmr.msra.gmra.mrb[18].mxu0 %vm144_vm5, %v4332_v5 }
 0xf24   :  { %3841 = vmatprep.mubr.msk.f32.mxu0 %vm144_vm5, %v4299_v49 }
 0xff6   :  { %v3829_v27 = vpop.f32.mrb[18].mxu0 }
 0xff7   :  { %v2244_v10 = vpop.f32.mrb[19].mxu0  ;;  %v2250_v3 = vadd.f32 %v3829_v27, %v4619_v8 }
 0xff8   :  { %v2245_v13 = vadd.f32 %v2244_v10, %v4616_v46 }
 0xffa   :  { %3834 = vmatprep.mubr.msk.f32.mxu1 %vm144_vm5, %v2245_v13 }
 0xffb   :  { %3835 = vmatmul.mubr.msk.f32.vlgmr.msra.gmra.mrb[20].mxu1 %vm144_vm5, %v2250_v3 }
 0xffc   :  { %3998 = vmatpush3.bf16.msra.mxu1 %v4386_v6 }
0x10ce   :  { %v3836_v1 = vpop.f32.mrb[20].mxu1 }
0x10cf   :  { %v2331_v47 = vadd.f32 %v3836_v1, %v4347_v15  ;;  %v2325_v48 = vpop.f32.mrb[21].mxu1 }
0x10d0   :  { %v2326_v54 = vadd.f32 %v2325_v48, %v4347_v15  ;;  %v4118_v48 = vld [vmem:[%s4783_s2] sm:$0xff] }
0x10d1   :  { %v2335_v49 = vsel %vm144_vm5, %v2331_v47, 0.0  ;;  %v2345_v57 = vmul.f32 %v2331_v47, %v2331_v47 }
0x10d2   :  { %v2334_v58 = vsel %vm144_vm5, %v2326_v54, 0.0  ;;  %v2344_v52 = vmul.f32 %v2326_v54, %v2326_v54 }
0x10d3   :  { %v2347_v60 = vsel %vm144_vm5, %v2345_v57, 0.0  ;;  %v2336_v0 = vadd.f32 %v2335_v49, %v2334_v58 }
0x10d4   :  { %v2346_v16 = vsel %vm144_vm5, %v2344_v52, 0.0 }
0x10d5   :  { %v2337_v59 = vrot.slane %v2336_v0, 4  ;;  %v2348_v63 = vadd.f32 %v2347_v60, %v2346_v16 }
0x10d7   :  { %v2338_v6 = vadd.f32 %v2337_v59, %v2336_v0  ;;  %v2349_v18 = vrot.slane %v2348_v63, 4 }
0x10d9   :  { %v2339_v19 = vrot.slane %v2338_v6, 2  ;;  %v2350_v22 = vadd.f32 %v2349_v18, %v2348_v63 }
0x10db   :  { %v2340_v29 = vadd.f32 %v2339_v19, %v2338_v6  ;;  %v2351_v31 = vrot.slane %v2350_v22, 2 }
0x10dd   :  { %v2341_v15 = vrot.slane %v2340_v29, 1  ;;  %v2352_v32 = vadd.f32 %v2351_v31, %v2350_v22 }
0x10df   :  { %v2342_v61 = vadd.f32 %v2341_v15, %v2340_v29  ;;  %v2353_v34 = vrot.slane %v2352_v32, 1 }
0x10e1   :  { %v2343_v62 = vmul.f32 0.0625, %v2342_v61  ;;  %v2354_v25 = vadd.f32 %v2353_v34, %v2352_v32 }
0x10e3   :  { %v2355_v4 = vmul.f32 0.0625, %v2354_v25  ;;  %v2356_v23 = vmul.f32 %v2343_v62, %v2343_v62  ;;  %v2358_v30 = vsub.f32 %v2326_v54, %v2343_v62  ;;  %v2359_v40 = vsub.f32 %v2331_v47, %v2343_v62 }
0x10e5   :  { %v2357_v41 = vsub.f32 %v2355_v4, %v2356_v23 }
0x10e7   :  { %v2360_v42 = vadd.f32 1e-05, %v2357_v41 }
0x10e9   :  { %4094 = vrsqrt.f32 %v2360_v42 }
0x10f3   :  { %v4095_v44 = vpop.eup %4094 }
0x10f4   :  { %v2362_v43 = vmul.f32 %v4095_v44, %v2358_v30  ;;  %v2363_v45 = vmul.f32 %v4095_v44, %v2359_v40 }
0x10f6   :  { %v2364_v50 = vmul.f32 %v2362_v43, %v4362_v51  ;;  %v2365_v27 = vmul.f32 %v2363_v45, %v4362_v51 }
0x10f8   :  { %v2366_v10 = vadd.f32 %v2364_v50, %v4366_v56  ;;  %v4642_v13 = vadd.f32 %v2365_v27, %v4366_v56 }
0x10fa   :  { %v3991_v3 = vpack.c.bf16 %v4642_v13, %v2366_v10 }
0x10fc   :  { %3992 = vmatprep.subr.bf16.mxu0 %v3991_v3 }
0x10fd   :  { %3994 = vmatpush3.bf16.msra.mxu0 %v3991_v3 }
0x10fe   :  { %4000 = vmatprep.subr.bf16.mxu0 %v4402_v21 }
0x1100   :  { %3842 = vmatmul.mubr.msk.f32.vlgmr.msra.gmra.mrb[20].mxu0 %vm144_vm5, %v4332_v5 }
0x1101   :  { %4002 = vmatpush3.bf16.msra.mxu0 %v4402_v21 }
0x1102   :  { %4004 = vmatprep.subr.bf16.mxu0 %v4412_v26 }
0x11d3   :  { %v3843_v1 = vpop.f32.mrb[20].mxu0 }
0x11d4   :  { %v2434_v51 = vpop.f32.mrb[21].mxu0  ;;  %v2440_v56 = vadd.f32 %v3843_v1, %v4619_v8 }
0x11d5   :  { %v2435_v47 = vadd.f32 %v2434_v51, %v4616_v46 }
0x11d7   :  { %3848 = vmatprep.mubr.msk.f32.mxu1 %vm144_vm5, %v2435_v47 }
0x11d8   :  { %3849 = vmatmul.mubr.msk.f32.vlgmr.msra.gmra.mrb[22].mxu1 %vm144_vm5, %v2440_v56 }
0x11d9   :  { %3869 = vmatprep.mubr.msk.f32.mxu1 %vm144_vm5, %v4118_v48 }
0x12ab   :  { %v3850_v5 = vpop.f32.mrb[22].mxu1 }
0x12ac   :  { %v2521_v21 = vadd.f32 %v3850_v5, %v4419_v28  ;;  %v2515_v54 = vpop.f32.mrb[23].mxu1 }
0x12ad   :  { %v2516_v49 = vadd.f32 %v2515_v54, %v4419_v28 }
0x12ae   :  { %v2525_v57 = vsel %vm144_vm5, %v2521_v21, 0.0  ;;  %v2535_v58 = vmul.f32 %v2521_v21, %v2521_v21 }
0x12af   :  { %v2524_v52 = vsel %vm144_vm5, %v2516_v49, 0.0  ;;  %v2534_v60 = vmul.f32 %v2516_v49, %v2516_v49 }
0x12b0   :  { %v2537_v0 = vsel %vm144_vm5, %v2535_v58, 0.0  ;;  %v2526_v16 = vadd.f32 %v2525_v57, %v2524_v52 }
0x12b1   :  { %v2536_v59 = vsel %vm144_vm5, %v2534_v60, 0.0 }
0x12b2   :  { %v2527_v63 = vrot.slane %v2526_v16, 4  ;;  %v2538_v6 = vadd.f32 %v2537_v0, %v2536_v59 }
0x12b4   :  { %v2528_v18 = vadd.f32 %v2527_v63, %v2526_v16  ;;  %v2539_v19 = vrot.slane %v2538_v6, 4 }
0x12b6   :  { %v2529_v22 = vrot.slane %v2528_v18, 2  ;;  %v2540_v29 = vadd.f32 %v2539_v19, %v2538_v6 }
0x12b8   :  { %v2530_v31 = vadd.f32 %v2529_v22, %v2528_v18  ;;  %v2541_v15 = vrot.slane %v2540_v29, 2 }
0x12ba   :  { %v2531_v28 = vrot.slane %v2530_v31, 1  ;;  %v2542_v32 = vadd.f32 %v2541_v15, %v2540_v29 }
0x12bc   :  { %v2532_v61 = vadd.f32 %v2531_v28, %v2530_v31  ;;  %v2543_v34 = vrot.slane %v2542_v32, 1 }
0x12be   :  { %v2533_v62 = vmul.f32 0.0625, %v2532_v61  ;;  %v2544_v25 = vadd.f32 %v2543_v34, %v2542_v32 }
0x12c0   :  { %v2545_v4 = vmul.f32 0.0625, %v2544_v25  ;;  %v2546_v23 = vmul.f32 %v2533_v62, %v2533_v62  ;;  %v2548_v30 = vsub.f32 %v2516_v49, %v2533_v62  ;;  %v2549_v40 = vsub.f32 %v2521_v21, %v2533_v62 }
0x12c2   :  { %v2547_v41 = vsub.f32 %v2545_v4, %v2546_v23 }
0x12c4   :  { %v2550_v42 = vadd.f32 1e-05, %v2547_v41 }
0x12c6   :  { %4096 = vrsqrt.f32 %v2550_v42  ;;  %v51_v42 = vld [vmem:[%s4786_s5 + $0x70] sm:$0xff] }
0x12d0   :  { %v4097_v44 = vpop.eup %4096 }
0x12d1   :  { %v2552_v43 = vmul.f32 %v4097_v44, %v2548_v30  ;;  %v2553_v45 = vmul.f32 %v4097_v44, %v2549_v40  ;;  %v52_v44 = vld [vmem:[%s4786_s5 + $0x78] sm:$0xff] }
0x12d3   :  { %v2554_v50 = vmul.f32 %v2552_v43, %v4429_v7  ;;  %v2555_v27 = vmul.f32 %v2553_v45, %v4429_v7  ;;  %v4119_v7 = vld [vmem:[%s4783_s2 + $0x8] sm:$0xff]  ;;  %v4019_v43 = vpack.c.bf16 %v52_v44, %v51_v42 }
0x12d5   :  { %v2556_v3 = vadd.f32 %v2554_v50, %v4433_v9  ;;  %v2557_v1 = vadd.f32 %v2555_v27, %v4433_v9 }
0x12d7   :  { %3855 = vmatprep.mubr.msk.f32.mxu0 %vm144_vm5, %v2556_v3  ;;  %v4007_v51 = vpack.c.bf16 %v2557_v1, %v2556_v3 }
0x12d8   :  { %3856 = vmatmul.mubr.msk.f32.vlgmr.msra.gmra.mrb[22].mxu0 %vm144_vm5, %v2557_v1 }
0x12d9   :  { %3862 = vmatprep.mubr.msk.f32.mxu0 %vm144_vm5, %v2366_v10  ;;  %4008 = vmatprep.subr.bf16.mxu1 %v4007_v51 }
0x12da   :  { %4010 = vmatpush3.bf16.msra.mxu1 %v4007_v51  ;;  %4006 = vmatpush3.bf16.msra.mxu0 %v4412_v26 }
0x12db   :  { %4012 = vmatprep.subr.bf16.mxu1 %v4454_v33  ;;  %4016 = vmatprep.subr.bf16.mxu0 %v4470_v38 }
0x12dd   :  { %3870 = vmatmul.mubr.msk.f32.vlgmr.msra.gmra.mrb[24].mxu1 %vm144_vm5, %v4119_v7 }
0x12de   :  { %4014 = vmatpush3.bf16.msra.mxu1 %v4454_v33 }
0x12df   :  { %4020 = vmatprep.subr.bf16.mxu1 %v4019_v43 }
0x12e0   :  { %3863 = vmatmul.mubr.msk.f32.vlgmr.msra.gmra.mrb[22].mxu0 %vm144_vm5, %v4642_v13 }
0x12e1   :  { %4018 = vmatpush3.bf16.msra.mxu0 %v4470_v38 }
0x13b0   :  { %v3871_v9 = vpop.f32.mrb[24].mxu1 }
0x13b1   :  { %v2786_v10 = vpop.f32.mrb[25].mxu1  ;;  %v2792_v47 = vadd.f32 %v3871_v9, %v4619_v8 }
0x13b2   :  { %v2787_v26 = vadd.f32 %v2786_v10, %v4616_v46 }
0x13b4   :  { %3876 = vmatprep.mubr.msk.f32.mxu1 %vm144_vm5, %v2787_v26 }
0x13b5   :  { %3877 = vmatmul.mubr.msk.f32.vlgmr.msra.gmra.mrb[26].mxu1 %vm144_vm5, %v2792_v47 }
0x13b6   :  { %4022 = vmatpush3.bf16.msra.mxu1 %v4019_v43 }
0x1488   :  { %v3878_v56 = vpop.f32.mrb[26].mxu1 }
0x1489   :  { %v2873_v48 = vadd.f32 %v3878_v56, %v4477_v17  ;;  %v2867_v5 = vpop.f32.mrb[27].mxu1 }
0x148a   :  { %v2868_v33 = vadd.f32 %v2867_v5, %v4477_v17 }
0x148b   :  { %v2877_v13 = vsel %vm144_vm5, %v2873_v48, 0.0  ;;  %v2887_v21 = vmul.f32 %v2873_v48, %v2873_v48 }
0x148c   :  { %v2876_v38 = vsel %vm144_vm5, %v2868_v33, 0.0  ;;  %v2886_v54 = vmul.f32 %v2868_v33, %v2868_v33 }
0x148d   :  { %v2889_v46 = vsel %vm144_vm5, %v2887_v21, 0.0  ;;  %v2878_v49 = vadd.f32 %v2877_v13, %v2876_v38 }
0x148e   :  { %v2888_v8 = vsel %vm144_vm5, %v2886_v54, 0.0 }
0x148f   :  { %v2879_v57 = vrot.slane %v2878_v49, 4  ;;  %v2890_v58 = vadd.f32 %v2889_v46, %v2888_v8 }
0x1491   :  { %v2880_v52 = vadd.f32 %v2879_v57, %v2878_v49  ;;  %v2891_v60 = vrot.slane %v2890_v58, 4 }
0x1493   :  { %v2881_v0 = vrot.slane %v2880_v52, 2  ;;  %v2892_v16 = vadd.f32 %v2891_v60, %v2890_v58 }
0x1495   :  { %v2882_v59 = vadd.f32 %v2881_v0, %v2880_v52  ;;  %v2893_v63 = vrot.slane %v2892_v16, 2 }
0x1497   :  { %v2883_v17 = vrot.slane %v2882_v59, 1  ;;  %v2894_v6 = vadd.f32 %v2893_v63, %v2892_v16 }
0x1499   :  { %v2884_v18 = vadd.f32 %v2883_v17, %v2882_v59  ;;  %v2895_v19 = vrot.slane %v2894_v6, 1 }
0x149b   :  { %v2885_v22 = vmul.f32 0.0625, %v2884_v18  ;;  %v2896_v29 = vadd.f32 %v2895_v19, %v2894_v6 }
0x149d   :  { %v2897_v31 = vmul.f32 0.0625, %v2896_v29  ;;  %v2898_v15 = vmul.f32 %v2885_v22, %v2885_v22  ;;  %v2900_v28 = vsub.f32 %v2868_v33, %v2885_v22  ;;  %v2901_v32 = vsub.f32 %v2873_v48, %v2885_v22 }
0x149f   :  { %v2899_v61 = vsub.f32 %v2897_v31, %v2898_v15  ;;  %v3032_v15 = vrot.slane %v4508_v37, %v4314_v53 }
0x14a1   :  { %v2902_v34 = vadd.f32 1e-05, %v2899_v61 }
0x14a3   :  { %4098 = vrsqrt.f32 %v2902_v34 }
0x14ad   :  { %v4099_v62 = vpop.eup %4098 }
0x14ae   :  { %v2904_v25 = vmul.f32 %v4099_v62, %v2900_v28  ;;  %v2905_v4 = vmul.f32 %v4099_v62, %v2901_v32 }
0x14b0   :  { %v2906_v23 = vmul.f32 %v2904_v25, %v4487_v24  ;;  %v2907_v30 = vmul.f32 %v2905_v4, %v4487_v24 }
0x14b2   :  { %v2908_v40 = vadd.f32 %v2906_v23, %v4491_v36  ;;  %v2909_v41 = vadd.f32 %v2907_v30, %v4491_v36 }
0x14b4   :  { %3883 = vmatprep.mubr.msk.f32.mxu0 %vm144_vm5, %v2908_v40 }
0x14b5   :  { %3884 = vmatmul.mubr.msk.f32.vlgmr.msra.gmra.mrb[22].mxu0 %vm144_vm5, %v2909_v41 }
0x1588   :  { %v3885_v24 = vpop.f32.mrb[22].mxu0 }
0x1589   :  { %v2994_v45 = vsel %vm144_vm5, %v3885_v24, 0.0  ;;  %v3004_v50 = vmul.f32 %v3885_v24, %v3885_v24  ;;  %v2982_v36 = vpop.f32.mrb[23].mxu0 }
0x158a   :  { %v2993_v27 = vsel %vm144_vm5, %v2982_v36, 0.0  ;;  %v3003_v3 = vmul.f32 %v2982_v36, %v2982_v36 }
0x158b   :  { %v3006_v1 = vsel %vm144_vm5, %v3004_v50, 0.0  ;;  %v2995_v51 = vadd.f32 %v2994_v45, %v2993_v27 }
0x158c   :  { %v3005_v7 = vsel %vm144_vm5, %v3003_v3, 0.0 }
0x158d   :  { %v2996_v9 = vrot.slane %v2995_v51, 4  ;;  %v3007_v10 = vadd.f32 %v3006_v1, %v3005_v7 }
0x158f   :  { %v2997_v26 = vadd.f32 %v2996_v9, %v2995_v51  ;;  %v3008_v47 = vrot.slane %v3007_v10, 4 }
0x1591   :  { %v2998_v56 = vrot.slane %v2997_v26, 2  ;;  %v3009_v48 = vadd.f32 %v3008_v47, %v3007_v10 }
0x1593   :  { %v2999_v5 = vadd.f32 %v2998_v56, %v2997_v26  ;;  %v3010_v33 = vrot.slane %v3009_v48, 2 }
0x1595   :  { %v3000_v13 = vrot.slane %v2999_v5, 1  ;;  %v3011_v21 = vadd.f32 %v3010_v33, %v3009_v48 }
0x1597   :  { %v3001_v38 = vadd.f32 %v3000_v13, %v2999_v5  ;;  %v3012_v54 = vrot.slane %v3011_v21, 1  ;;  %v3149_v13 = vrot.slane %v4508_v37, %v4319_v55 }
0x1599   :  { %v3002_v46 = vmul.f32 0.0625, %v3001_v38  ;;  %v3013_v49 = vadd.f32 %v3012_v54, %v3011_v21 }
0x159b   :  { %v3014_v8 = vmul.f32 0.0625, %v3013_v49  ;;  %v3015_v57 = vmul.f32 %v3002_v46, %v3002_v46  ;;  %v3017_v58 = vsub.f32 %v2982_v36, %v3002_v46  ;;  %v3018_v52 = vsub.f32 %v3885_v24, %v3002_v46 }
0x159c   :  { %v3155_v46 = vrot.slane %v4508_v37, %v4234_v11 }
0x159d   :  { %v3016_v60 = vsub.f32 %v3014_v8, %v3015_v57 }
0x159f   :  { %v3019_v0 = vadd.f32 1e-05, %v3016_v60 }
0x15a1   :  { %4100 = vrsqrt.f32 %v3019_v0 }
0x15ab   :  { %v4101_v16 = vpop.eup %4100 }
0x15ac   :  { %v3021_v59 = vmul.f32 %v4101_v16, %v3017_v58  ;;  %v3022_v63 = vmul.f32 %v4101_v16, %v3018_v52  ;;  %v3242_v52 = vrot.slane %v4508_v37, %v4283_v20 }
0x15ae   :  { %v3023_v17 = vmul.f32 %v3021_v59, %v4513_v39  ;;  %v3024_v6 = vmul.f32 %v3022_v63, %v4513_v39  ;;  %v53_v39 = vld [vmem:[%s4786_s5 + $0x80] sm:$0xff] }
0x15b0   :  { %v3025_v18 = vadd.f32 %v3023_v17, %v4517_v12  ;;  %v3026_v19 = vadd.f32 %v3024_v6, %v4517_v12  ;;  %v54_v12 = vld [vmem:[%s4786_s5 + $0x88] sm:$0xff] }
0x15b1   :  { %v4023_v31 = vpack.c.bf16 %v54_v12, %v53_v39 }
0x15b2   :  { %v4712_v22 = vmax.f32 %v3025_v18, 0.0  ;;  %v4714_v29 = vmax.f32 %v3026_v19, 0.0 }
0x15b3   :  { %4024 = vmatprep.subr.bf16.mxu0 %v4023_v31 }
0x15b4   :  { %3890 = vmatprep.mubr.msk.f32.mxu1 %vm144_vm5, %v4712_v22  ;;  %4026 = vmatpush3.bf16.msra.mxu0 %v4023_v31 }
0x15b5   :  { %3891 = vmatmul.mubr.msk.f32.vlgmr.msra.gmra.mrb[28].mxu1 %vm144_vm5, %v4714_v29 }
0x15b6   :  { %3904 = vmatprep.mubr.msk.f32.mxu1 %vm4146_vm2, %v4145_v2 }
0x1688   :  { %v3892_v28 = vpop.f32.mrb[28].mxu1 }
0x1689   :  { %v3111_v32 = vadd.f32 %v3892_v28, %v3032_v15  ;;  %v3105_v61 = vpop.f32.mrb[29].mxu1 }
0x168a   :  { %v3106_v34 = vadd.f32 %v3105_v61, %v3032_v15 }
0x168b   :  { %4102 = vtanh.f32 %v3111_v32 }
0x168c   :  { %4104 = vtanh.f32 %v3106_v34 }
0x1695   :  { %v4103_v2 = vpop.eup %4102 }
0x1696   :  { %v4105_v62 = vpop.eup %4104  ;;  %v3127_v25 = vmul.f32 %v4103_v2, %v4103_v2  ;;  %v3117_v4 = vsel %vm144_vm5, %v4103_v2, 0.0 }
0x1697   :  { %v3126_v23 = vmul.f32 %v4105_v62, %v4105_v62  ;;  %v3116_v30 = vsel %vm144_vm5, %v4105_v62, 0.0 }
0x1698   :  { %v3129_v40 = vsel %vm144_vm5, %v3127_v25, 0.0  ;;  %v3118_v41 = vadd.f32 %v3117_v4, %v3116_v30 }
0x1699   :  { %v3128_v42 = vsel %vm144_vm5, %v3126_v23, 0.0 }
0x169a   :  { %v3130_v53 = vadd.f32 %v3129_v40, %v3128_v42  ;;  %v3119_v44 = vrot.slane %v3118_v41, 4 }
0x169c   :  { %v3131_v43 = vrot.slane %v3130_v53, 4  ;;  %v3120_v24 = vadd.f32 %v3119_v44, %v3118_v41  ;;  %v4120_v44 = vld [vmem:[%s4787_s6 + $0x10] sm:$0xff]  ;;  %s4151_s6 = smov 16  }
0x169e   :  { %v3121_v45 = vrot.slane %v3120_v24, 2  ;;  %v3132_v50 = vadd.f32 %v3131_v43, %v3130_v53  ;;  %v3279_v43 = vrot.slane %v4120_v44, %v4286_v35 }
0x16a0   :  { %v3122_v36 = vadd.f32 %v3121_v45, %v3120_v24  ;;  %v3133_v27 = vrot.slane %v3132_v50, 2 }
0x16a2   :  { %v3123_v3 = vrot.slane %v3122_v36, 1  ;;  %v3134_v1 = vadd.f32 %v3133_v27, %v3132_v50  ;;  %v3285_v50 = vrot.slane %v4120_v44, %v4343_v14 }
0x16a4   :  { %v3124_v51 = vadd.f32 %v3123_v3, %v3122_v36  ;;  %v3135_v7 = vrot.slane %v3134_v1, 1 }
0x16a6   :  { %v3125_v9 = vmul.f32 0.0625, %v3124_v51  ;;  %v3136_v10 = vadd.f32 %v3135_v7, %v3134_v1 }
0x16a8   :  { %v3137_v26 = vmul.f32 0.0625, %v3136_v10  ;;  %v3138_v47 = vmul.f32 %v3125_v9, %v3125_v9  ;;  %v3140_v56 = vsub.f32 %v4105_v62, %v3125_v9  ;;  %v3141_v48 = vsub.f32 %v4103_v2, %v3125_v9 }
0x16aa   :  { %v3139_v5 = vsub.f32 %v3137_v26, %v3138_v47 }
0x16ac   :  { %v3142_v33 = vadd.f32 1e-05, %v3139_v5 }
0x16ae   :  { %4106 = vrsqrt.f32 %v3142_v33 }
0x16b8   :  { %v4107_v21 = vpop.eup %4106 }
0x16b9   :  { %v3144_v38 = vmul.f32 %v4107_v21, %v3140_v56  ;;  %v3145_v54 = vmul.f32 %v4107_v21, %v3141_v48  ;;  %v4147_v21 = vmov 1  }
0x16ba   :  { %4053 = vset.pattern.permute.xlu0 %v4147_v21  ;;  %4054 = vset.pattern.permute.xlu1 %v4147_v21 }
0x16bb   :  { %v3150_v49 = vmul.f32 %v3149_v13, %v3144_v38  ;;  %v3151_v8 = vmul.f32 %v3149_v13, %v3145_v54 }
0x16bd   :  { %v3156_v57 = vadd.f32 %v3155_v46, %v3150_v49  ;;  %v3157_v58 = vadd.f32 %v3155_v46, %v3151_v8 }
0x16bf   :  { %3897 = vmatprep.mubr.msk.f32.mxu0 %vm144_vm5, %v3156_v57 }
0x16c0   :  { %3898 = vmatmul.mubr.msk.f32.vlgmr.msra.gmra.mrb[24].mxu0 %vm144_vm5, %v3157_v58  ;;  %v4148_v58 = vmov 3  }
0x1793   :  { %v3899_v60 = vpop.f32.mrb[24].mxu0 }
0x1794   :  { %v3244_v55 = vadd.f32 %v3899_v60, %v3242_v52  ;;  %v3230_v0 = vpop.f32.mrb[25].mxu0  ;;  %v4150_v60 = vmov 0  }
0x1795   :  { %v3243_v16 = vadd.f32 %v3242_v52, %v3230_v0  ;;  %v4149_v52 = vmov 2  }
0x1796   :  { %v3247_v59 = vsel %vm3245_vm6, %v3244_v55, 0.0  ;;  %v3257_v63 = vmul.f32 %v3244_v55, %v3244_v55 }
0x1797   :  { %v3246_v11 = vsel %vm3245_vm6, %v3243_v16, 0.0  ;;  %v3256_v17 = vmul.f32 %v3243_v16, %v3243_v16 }
0x1798   :  { %v3259_v6 = vsel %vm3245_vm6, %v3257_v63, 0.0  ;;  %v3248_v18 = vadd.f32 %v3247_v59, %v3246_v11 }
0x1799   :  { %v3258_v19 = vsel %vm3245_vm6, %v3256_v17, 0.0 }
0x179a   :  { %v3249_v39 = vrot.slane %v3248_v18, 4  ;;  %v3260_v12 = vadd.f32 %v3259_v6, %v3258_v19 }
0x179c   :  { %v3250_v31 = vadd.f32 %v3249_v39, %v3248_v18  ;;  %v3261_v20 = vrot.slane %v3260_v12, 4 }
0x179e   :  { %v3251_v37 = vrot.slane %v3250_v31, 2  ;;  %v3262_v15 = vadd.f32 %v3261_v20, %v3260_v12  ;;  %v4153_v12 = vmov 0.0|0.0  }
0x179f   :  { %4027 = vmatprep.subr.bf16.mxu1 %v4153_v12 }
0x17a0   :  { %v3252_v28 = vadd.f32 %v3251_v37, %v3250_v31  ;;  %v3263_v32 = vrot.slane %v3262_v15, 2 }
0x17a2   :  { %v3253_v61 = vrot.slane %v3252_v28, 1  ;;  %v3264_v34 = vadd.f32 %v3263_v32, %v3262_v15 }
0x17a4   :  { %v3254_v2 = vadd.f32 %v3253_v61, %v3252_v28  ;;  %v3265_v62 = vrot.slane %v3264_v34, 1 }
0x17a6   :  { %v3255_v25 = vmul.f32 0.0625, %v3254_v2  ;;  %v3266_v4 = vadd.f32 %v3265_v62, %v3264_v34 }
0x17a8   :  { %v3267_v23 = vmul.f32 0.0625, %v3266_v4  ;;  %v3268_v30 = vmul.f32 %v3255_v25, %v3255_v25  ;;  %v3270_v40 = vsub.f32 %v3243_v16, %v3255_v25  ;;  %v3271_v41 = vsub.f32 %v3244_v55, %v3255_v25 }
0x17aa   :  { %v3269_v42 = vsub.f32 %v3267_v23, %v3268_v30 }
0x17ac   :  { %v3272_v53 = vadd.f32 1e-05, %v3269_v42 }
0x17ae   :  { %4108 = vrsqrt.f32 %v3272_v53 }
0x17b8   :  { %v4109_v24 = vpop.eup %4108 }
0x17b9   :  { %v3274_v45 = vmul.f32 %v4109_v24, %v3270_v40  ;;  %v3275_v36 = vmul.f32 %v4109_v24, %v3271_v41 }
0x17bb   :  { %v3280_v27 = vmul.f32 %v3279_v43, %v3274_v45  ;;  %v3281_v3 = vmul.f32 %v3279_v43, %v3275_v36 }
0x17bd   :  { %v3286_v1 = vadd.f32 %v3285_v50, %v3280_v27  ;;  %v3287_v7 = vadd.f32 %v3285_v50, %v3281_v3 }
0x17bf   :  { %v3288_v51 = vsel %vm3245_vm6, %v3286_v1, -inf  ;;  %v3291_v9 = vsel %vm3245_vm6, %v3287_v7, -inf }
0x17c0   :  { %3289 = vmax.xlane.f32.xlu0 %v3288_v51 }
0x17c4   :  { %3292 = vmax.xlane.f32.xlu0 %v3291_v9 }
0x184d   :  { %v3290_v10 = vpop.xlane.xlu0 %3289 }
0x184e   :  { %v3294_v26 = vsub.f32 %v3286_v1, %v3290_v10 }
0x1850   :  { %v3296_v47 = vmul.f32 1.442695, %v3294_v26 }
0x1851   :  { %v3293_v56 = vpop.xlane.xlu0 %3292 }
0x1852   :  { %4110 = vpow2.f32 %v3296_v47  ;;  %v3295_v35 = vsub.f32 %v3287_v7, %v3293_v56 }
0x1854   :  { %v3298_v48 = vmul.f32 1.442695, %v3295_v35 }
0x1856   :  { %4112 = vpow2.f32 %v3298_v48 }
0x185c   :  { %v4111_v14 = vpop.eup %4110 }
0x185d   :  { %v3300_v5 = vsel %vm3245_vm6, %v4111_v14, 0.0 }
0x185e   :  { %3301 = vadd.xlane.f32.xlu1 %v3300_v5 }
0x1860   :  { %v4113_v33 = vpop.eup %4112 }
0x1861   :  { %v3303_v13 = vsel %vm3245_vm6, %v4113_v33, 0.0 }
0x1862   :  { %3304 = vadd.xlane.f32.xlu1 %v3303_v13 }
0x18eb   :  { %v3302_v38 = vpop.xlane.xlu1 %3301 }
0x18ec   :  { %4114 = vrcp.f32 %v3302_v38 }
0x18ef   :  { %v3305_v54 = vpop.xlane.xlu1 %3304 }
0x18f0   :  { %4116 = vrcp.f32 %v3305_v54 }
0x18f6   :  { %v4115_v46 = vpop.eup %4114 }
0x18f7   :  { %v3307_v49 = vmul.f32 %v4115_v46, %v4111_v14 }
0x18f9   :  { %3323 = vperm.xlu0 %4053, %v3307_v49  }
0x18fa   :  { %v4117_v8 = vpop.eup %4116 }
0x18fb   :  { %v3309_v57 = vmul.f32 %v4117_v8, %v4113_v33 }
0x18fd   :  { %3327 = vperm.xlu1 %4054, %v3309_v57   ;;  %4073 = vset.pattern.permute.xlu0 %v4148_v58 }
0x1901   :  { %4055 = vset.pattern.permute.xlu1 %v4149_v52 }
0x1902   :  { %3333 = vperm.xlu1 %4055, %v3307_v49  }
0x1906   :  { %3337 = vperm.xlu1 %4055, %v3309_v57  }
0x190a   :  { %4056 = vset.pattern.permute.xlu1 %v4148_v58 }
0x190b   :  { %3343 = vperm.xlu1 %4056, %v3307_v49  }
0x190f   :  { %3347 = vperm.xlu1 %4056, %v3309_v57  }
0x1913   :  { %4057 = vset.pattern.permute.xlu1 %v4150_v60 }
0x1914   :  { %3312 = vperm.xlu1 %4057, %v3307_v49  }
0x1918   :  { %3317 = vperm.xlu1 %4057, %v3309_v57  }
0x1978   :  { %v3324_v55 = vpop.permute.xlu0 %3323 }
0x1979   :  { %v3330_v16 = vmul.f32 %v3324_v55, %v4712_v22 }
0x197c   :  { %v3328_v0 = vpop.permute.xlu1 %3327 }
0x197d   :  { %v3331_v59 = vmul.f32 %v3328_v0, %v4714_v29 }
0x197f   :  { %v4058_v63 = vpack.i.bf16 %v3331_v59, %v3330_v16 }
0x1981   :  { %v3334_v11 = vpop.permute.xlu1 %3333  ;;  %4059 = vrot.lane.b32.xlu1 %v4058_v63, %s4151_s6 }
0x1982   :  { %v3340_v6 = vmul.f32 %v3334_v11, %v4712_v22 }
0x1985   :  { %v3338_v17 = vpop.permute.xlu1 %3337 }
0x1986   :  { %v3341_v18 = vmul.f32 %v3338_v17, %v4714_v29 }
0x1988   :  { %v4063_v19 = vpack.i.bf16 %v3341_v18, %v3340_v6 }
0x198a   :  { %4064 = vrot.lane.b32.xlu0 %v4063_v19, %s4152_s13  ;;  %v3344_v39 = vpop.permute.xlu1 %3343 }
0x198b   :  { %v3350_v20 = vmul.f32 %v3344_v39, %v4712_v22 }
0x198e   :  { %v3348_v31 = vpop.permute.xlu1 %3347 }
0x198f   :  { %v3351_v37 = vmul.f32 %v3348_v31, %v4714_v29 }
0x1991   :  { %v4068_v15 = vpack.i.bf16 %v3351_v37, %v3350_v20 }
0x1993   :  { %4069 = vrot.lane.b32.xlu1 %v4068_v15, %s4154_s0  ;;  %v3313_v28 = vpop.permute.xlu1 %3312 }
0x1994   :  { %v3320_v23 = vmul.f32 %v3313_v28, %v4712_v22  ;;  %v36_v22 = vld [vmem:[%s4785_s4] sm:$0x3] }
0x1997   :  { %v3318_v32 = vpop.permute.xlu1 %3317 }
0x1998   :  { %v3321_v30 = vmul.f32 %v3318_v32, %v4714_v29 }
0x19f3   :  { %v4060_v61 = vpop.permute.xlu1 %4059 }
0x19f4   :  { %v4062_v2 = vunpack.i.h.bf16 %v4060_v61  ;;  %v4061_v62 = vunpack.i.l.bf16 %v4060_v61 }
0x19f6   :  { %v3377_v41 = vsel %vm144_vm5, %v3321_v30, %v4062_v2  ;;  %v3376_v42 = vsel %vm144_vm5, %v3320_v23, %v4061_v62 }
0x19fc   :  { %v4065_v34 = vpop.permute.xlu0 %4064 }
0x19fd   :  { %v4067_v25 = vunpack.i.h.bf16 %v4065_v34  ;;  %v4066_v4 = vunpack.i.l.bf16 %v4065_v34 }
0x19ff   :  { %v3380_v43 = vsel %vm3378_vm7, %v3377_v41, %v4067_v25  ;;  %v3379_v24 = vsel %vm3378_vm7, %v3376_v42, %v4066_v4 }
0x1a05   :  { %v4070_v40 = vpop.permute.xlu1 %4069 }
0x1a06   :  { %v4072_v53 = vunpack.i.h.bf16 %v4070_v40  ;;  %v4071_v44 = vunpack.i.l.bf16 %v4070_v40 }
0x1a08   :  { %v3382_v45 = vsel %vm3381_vm8, %v3379_v24, %v4071_v44  ;;  %v3383_v50 = vsel %vm3381_vm8, %v3380_v43, %v4072_v53 }
0x1a09   :  { %v4028_v36 = vpack.c.bf16 %v3383_v50, %v3382_v45 }
0x1a0b   :  { %4029 = vmatpush3.bf16.msra.mxu1 %v4028_v36 }
0x1a0e   :  { %3905 = vmatmul.mubr.msk.f32.vlgmr.msra.gmra.mrb[30].mxu1 %vm144_vm5, %v36_v22 }
0x1ae1   :  { %v3453_v29 = vpop.f32.mrb[30].mxu1 }
0x1ae2   :  { %v3457_v27 = vmax.f32 %v3453_v29, 0.0  ;;  %v3906_v3 = vpop.f32.mrb[31].mxu1 }
0x1ae4   :  { %3459 = vst.msk [vmem:[#allocation2] sm:$0x3] %vm3458_vm9, %v3457_v27 }
0x1ae5   :  { %4132 = shalt.err (!%p4129_p4)
}
0x1ae6   :  { %s4133_s4 = scalar_lea.hbm %s4788_s7, 32 }
0x1ae7   :  { %p4134_p5 = scmp.ne.s32.totalorder %s4788_s7, %s4133_s4  ;;  %p4137_p6 = scmp.lt.u32.totalorder %s4133_s4, %s4788_s7 }
0x1ae9   :  { %p4139_p7 = pnand %p4137_p6, %p4134_p5 }
0x1aeb   :  { %4142 = shalt.err (!%p4139_p7)
}
0x1aec   :  { %3469 = dma.vmem_to_hbm [thread:$0]  %s3467_s17, 32, %s4788_s7, [#allocation3]  }
0x1aed   :  { %4143 = dma.done.wait [#allocation3], 32  }
0x1aee   :  { %4144 = vsyncadd [#allocation3], 4294967264 }
0x1aef   :  { %3473 = vsyncpa [#allocation3], 1 }

</bundles_post_ra>
